<compile_context>
chip_gen: v7x
topology: tpu7x:2x2x1
jax: 0.10.0
libtpu: 0.0.40
codegen_flags: <defaults>
</compile_context>

<pallas_src>
import functools
import math

import jax
import jax.numpy as jnp
from jax import lax
from jax.experimental import pallas as pl
from jax.experimental.pallas import tpu as pltpu


MXU_DTYPE = jnp.bfloat16          # MXU operand dtype; accumulation stays f32


# ---------------------------------------------------------------------------
# Per-generation tuning (VMEM budget, tile preferences)
# ---------------------------------------------------------------------------

def _chip_kind():
    try:
        return jax.devices()[0].device_kind.lower()
    except Exception:  # pragma: no cover
        return ""


_KIND = _chip_kind()
_IS_V5 = "v5" in _KIND
_IS_V6 = "v6" in _KIND
# v5e/v6e: 128 MiB physical VMEM -> large budget; v7x/unknown: 64 MiB physical
# -> leave headroom for double-buffers, accumulator scratch and spills.
_VMEM_LIMIT = (100 * 1024 * 1024) if (_IS_V5 or _IS_V6) else (44 * 1024 * 1024)

_TM_PREFS = (512, 256, 128, 64, 32, 16, 8) if (_IS_V5 or _IS_V6) \
    else (256, 128, 64, 32, 16, 8)
_TK_PREFS = (1024, 512, 256, 128) if (_IS_V5 or _IS_V6) else (512, 256, 128)
_TN_PREFS = (512, 256, 128)


def _pick_tile(dim, prefs):
    """Largest preferred tile that evenly divides dim, else the full dim."""
    for p in prefs:
        if p <= dim and dim % p == 0:
            return p
    return dim


# ----------------------------------------------------------------------------
# Dense matmul kernel with fused epilogue (bias, GELU, residual, LN, L2-norm)
# ----------------------------------------------------------------------------

def _dense_kernel(x_ref, w_ref, b_ref, *rest,
                  activation, has_residual, has_ln, l2norm, eps):
    rest = list(rest)
    res_ref = rest.pop(0) if has_residual else None
    if has_ln:
        g_ref = rest.pop(0)
        be_ref = rest.pop(0)
    o_ref, acc_ref = rest

    @pl.when(pl.program_id(2) == 0)
    def _init():
        acc_ref[...] = jnp.zeros_like(acc_ref)

    # x / w arrive pre-cast to bf16 in HBM -> no per-step converts here.
    acc_ref[...] += jnp.dot(x_ref[...], w_ref[...],
                            preferred_element_type=jnp.float32)

    @pl.when(pl.program_id(2) == pl.num_programs(2) - 1)
    def _epilogue():
        y = acc_ref[...] + b_ref[...]
        if activation == "gelu":
            # tanh-approximated GELU (EUP tanh)
            c = 0.7978845608028654  # sqrt(2/pi)
            y = 0.5 * y * (1.0 + jnp.tanh(c * (y + 0.044715 * y * y * y)))
        if has_residual:
            y = y + res_ref[...].astype(jnp.float32)
        if has_ln:
            mu = jnp.mean(y, axis=-1, keepdims=True)
            var = jnp.mean((y - mu) * (y - mu), axis=-1, keepdims=True)
            y = (y - mu) * lax.rsqrt(var + eps) * g_ref[...] + be_ref[...]
        if l2norm:
            ss = jnp.sum(y * y, axis=-1, keepdims=True)
            # matches torch F.normalize(p=2, eps=1e-12): x / max(||x||, eps)
            y = y * lax.rsqrt(jnp.maximum(ss, 1e-24))
        o_ref[...] = y.astype(o_ref.dtype)


def dense(x, w, b, *, activation=None, residual=None, ln=None, l2norm=False,
          eps=1e-12, out_dtype=MXU_DTYPE):
    x = x.astype(MXU_DTYPE)        # no-op when producer already emitted bf16
    w = w.astype(MXU_DTYPE)        # no-op: weights are bf16 in HBM from init
    m, kdim = x.shape
    n = w.shape[1]

    tm = _pick_tile(m, _TM_PREFS)
    tk = _pick_tile(kdim, _TK_PREFS)
    # LN / L2 epilogues need the whole output row resident in one block.
    tn = n if (ln is not None or l2norm) else _pick_tile(n, _TN_PREFS)
    grid = (m // tm, n // tn, kdim // tk)

    w_spec_kwargs = {}
    if _IS_V5 and (kdim // tk) >= 3:
        # v5e: lowest HBM BW relative to MXU -> deepen weight pipeline on k.
        w_spec_kwargs["pipeline_mode"] = pl.Buffered(3)

    in_specs = [
        pl.BlockSpec((tm, tk), lambda i, j, kk: (i, kk)),
        pl.BlockSpec((tk, tn), lambda i, j, kk: (kk, j), **w_spec_kwargs),
        pl.BlockSpec((1, tn), lambda i, j, kk: (0, j)),
    ]
    inputs = [x, w, b.reshape(1, n)]
    extra_bytes = 4 * n
    if residual is not None:
        in_specs.append(pl.BlockSpec((tm, tn), lambda i, j, kk: (i, j)))
        inputs.append(residual)
        extra_bytes += residual.dtype.itemsize * m * n
    if ln is not None:
        gamma, beta = ln
        in_specs.append(pl.BlockSpec((1, tn), lambda i, j, kk: (0, j)))
        in_specs.append(pl.BlockSpec((1, tn), lambda i, j, kk: (0, j)))
        inputs.append(gamma.reshape(1, n))
        inputs.append(beta.reshape(1, n))
        extra_bytes += 8 * n

    kernel = functools.partial(
        _dense_kernel, activation=activation,
        has_residual=residual is not None, has_ln=ln is not None,
        l2norm=l2norm, eps=eps)

    out_itemsize = jnp.dtype(out_dtype).itemsize
    return pl.pallas_call(
        kernel,
        out_shape=jax.ShapeDtypeStruct((m, n), out_dtype),
        grid=grid,
        in_specs=in_specs,
        out_specs=pl.BlockSpec((tm, tn), lambda i, j, kk: (i, j)),
        scratch_shapes=[pltpu.VMEM((tm, tn), jnp.float32)],
        compiler_params=pltpu.CompilerParams(
            dimension_semantics=("parallel", "parallel", "arbitrary"),
            vmem_limit_bytes=_VMEM_LIMIT),
        cost_estimate=pl.CostEstimate(
            flops=2 * m * n * kdim,
            transcendentals=(m * n if activation == "gelu" else 0),
            bytes_accessed=2 * (m * kdim + kdim * n)
            + out_itemsize * m * n + extra_bytes),
    )(*inputs)


# ----------------------------------------------------------------------------
# Row-tiled LayerNorm (only used for the embedding LN; the rest is fused)
# ----------------------------------------------------------------------------

def _layernorm_kernel(x_ref, g_ref, b_ref, o_ref, *, eps):
    x = x_ref[...].astype(jnp.float32)
    mu = jnp.mean(x, axis=-1, keepdims=True)
    var = jnp.mean((x - mu) * (x - mu), axis=-1, keepdims=True)
    y = (x - mu) * lax.rsqrt(var + eps) * g_ref[...] + b_ref[...]
    o_ref[...] = y.astype(o_ref.dtype)


def layernorm(x, gamma, beta, eps=1e-12, out_dtype=MXU_DTYPE):
    n, h = x.shape
    tm = _pick_tile(n, _TM_PREFS)
    return pl.pallas_call(
        functools.partial(_layernorm_kernel, eps=eps),
        out_shape=jax.ShapeDtypeStruct((n, h), out_dtype),
        grid=(n // tm,),
        in_specs=[pl.BlockSpec((tm, h), lambda i: (i, 0)),
                  pl.BlockSpec((1, h), lambda i: (0, 0)),
                  pl.BlockSpec((1, h), lambda i: (0, 0))],
        out_specs=pl.BlockSpec((tm, h), lambda i: (i, 0)),
        compiler_params=pltpu.CompilerParams(
            dimension_semantics=("parallel",),
            vmem_limit_bytes=_VMEM_LIMIT),
    )(x, gamma.reshape(1, h), beta.reshape(1, h))


# ----------------------------------------------------------------------------
# Multi-head attention: one (batch, head) pair per grid step.
# Head-major per-operand layout (B, nH, Tq/S, dH): each head's Q/K/V block is
# fetched by BlockSpec (no sub-128-lane slicing), mask broadcast in-VMEM,
# scores/softmax in f32, bf16 MXU operands, bf16 output blocks.
# ----------------------------------------------------------------------------

def _attention_kernel(q_ref, k_ref, v_ref, mask_ref, o_ref, *, scale):
    q = q_ref[0, 0]                       # (Tq, dH) bf16
    k = k_ref[0, 0]                       # (S,  dH) bf16
    v = v_ref[0, 0]                       # (S,  dH) bf16
    m = mask_ref[0]                       # (1, S) additive mask, f32
    # scores: contract last dims directly (no k.T transpose)
    sc = lax.dot_general(q, k, (((1,), (1,)), ((), ())),
                         preferred_element_type=jnp.float32)   # (Tq, S)
    sc = sc * scale + m
    sc = sc - jnp.max(sc, axis=-1, keepdims=True)
    p = jnp.exp(sc)
    p = p * pl.reciprocal(jnp.sum(p, axis=-1, keepdims=True), approx=True)
    ctx = jnp.dot(p.astype(MXU_DTYPE), v,
                  preferred_element_type=jnp.float32)           # (Tq, dH)
    o_ref[0, 0] = ctx.astype(o_ref.dtype)


def attention(q, k, v, add_mask, *, scale):
    b, nh, tq, dh = q.shape
    s = k.shape[2]
    flops = 4 * b * nh * tq * s * dh
    bytes_acc = (2 * (q.size + k.size + v.size) + 4 * add_mask.size
                 + 2 * b * nh * tq * dh)
    return pl.pallas_call(
        functools.partial(_attention_kernel, scale=scale),
        out_shape=jax.ShapeDtypeStruct((b, nh, tq, dh), MXU_DTYPE),
        grid=(b, nh),
        in_specs=[pl.BlockSpec((1, 1, tq, dh), lambda bi, hi: (bi, hi, 0, 0)),
                  pl.BlockSpec((1, 1, s, dh), lambda bi, hi: (bi, hi, 0, 0)),
                  pl.BlockSpec((1, 1, s, dh), lambda bi, hi: (bi, hi, 0, 0)),
                  pl.BlockSpec((1, 1, s), lambda bi, hi: (bi, 0, 0))],
        out_specs=pl.BlockSpec((1, 1, tq, dh), lambda bi, hi: (bi, hi, 0, 0)),
        compiler_params=pltpu.CompilerParams(
            dimension_semantics=("parallel", "parallel"),
            vmem_limit_bytes=_VMEM_LIMIT),
        cost_estimate=pl.CostEstimate(
            flops=flops, transcendentals=b * nh * tq * s,
            bytes_accessed=bytes_acc),
    )(q.astype(MXU_DTYPE), k.astype(MXU_DTYPE), v.astype(MXU_DTYPE), add_mask)


# ----------------------------------------------------------------------------
# Synthetic "BERT" gloss encoder (small config, deterministic init)
# ----------------------------------------------------------------------------

class Config:
    vocab_size = 50
    type_vocab_size = 2
    max_position = 16
    hidden = 32            # stands in for gloss_hdim=768
    num_heads = 4
    head_dim = 8
    intermediate = 64
    num_layers = 2


def init_params(cfg, key):
    def nrm(k, shape, dtype=jnp.float32):
        return (0.02 * jax.random.normal(k, shape, dtype=jnp.float32)
                ).astype(dtype)

    keys = iter(jax.random.split(key, 64))
    p = {
        "word_emb": nrm(next(keys), (cfg.vocab_size, cfg.hidden)),
        "pos_emb": nrm(next(keys), (cfg.max_position, cfg.hidden)),
        "type_emb": nrm(next(keys), (cfg.type_vocab_size, cfg.hidden)),
        "emb_ln_g": jnp.ones((cfg.hidden,), jnp.float32),
        "emb_ln_b": jnp.zeros((cfg.hidden,), jnp.float32),
        "layers": [],
    }
    for _ in range(cfg.num_layers):
        layer = {
            # fused QKV projection: [H, 3H] bf16 weight (pre-cast in HBM)
            "w_qkv": nrm(next(keys), (cfg.hidden, 3 * cfg.hidden), MXU_DTYPE),
            "b_qkv": jnp.zeros((3 * cfg.hidden,), jnp.float32),
            "wo": nrm(next(keys), (cfg.hidden, cfg.hidden), MXU_DTYPE),
            "bo": jnp.zeros((cfg.hidden,), jnp.float32),
            "ln1_g": jnp.ones((cfg.hidden,), jnp.float32),
            "ln1_b": jnp.zeros((cfg.hidden,), jnp.float32),
            "w1": nrm(next(keys), (cfg.hidden, cfg.intermediate), MXU_DTYPE),
            "b1": jnp.zeros((cfg.intermediate,), jnp.float32),
            "w2": nrm(next(keys), (cfg.intermediate, cfg.hidden), MXU_DTYPE),
            "b2": jnp.zeros((cfg.hidden,), jnp.float32),
            "ln2_g": jnp.ones((cfg.hidden,), jnp.float32),
            "ln2_b": jnp.zeros((cfg.hidden,), jnp.float32),
        }
        p["layers"].append(layer)
    return p


def gloss_encoder_forward(params, input_ids, attention_mask, token_type_ids, cfg):
    b, s = input_ids.shape
    h, nh, dh = cfg.hidden, cfg.num_heads, cfg.head_dim
    scale = 1.0 / math.sqrt(dh)

    # ---- embeddings (gather is glue; LN is a tiled Pallas kernel, bf16 out) ----
    x = (jnp.take(params["word_emb"], input_ids, axis=0)
         + params["pos_emb"][None, :s, :]
         + jnp.take(params["type_emb"], token_type_ids, axis=0))     # (B, S, H)
    x = layernorm(x.reshape(b * s, h), params["emb_ln_g"], params["emb_ln_b"])

    # ---- additive attention mask, (B, 1, S); broadcast happens in-kernel ----
    add_mask = ((1.0 - attention_mask.astype(jnp.float32)) * -1e9
                ).reshape(b, 1, s)

    n_layers = len(params["layers"])
    for li, layer in enumerate(params["layers"]):
        last = li == n_layers - 1

        # fused QKV projection: one pallas_call, x read once; bf16 output
        qkv = dense(x, layer["w_qkv"], layer["b_qkv"])               # (B*S, 3H)

        # head split (plain-JAX glue): (B*S, 3H) -> (3, B, nH, S, dH) head-major
        qkv5 = jnp.transpose(qkv.reshape(b, s, 3, nh, dh), (2, 0, 3, 1, 4))
        q_h, k_h, v_h = qkv5[0], qkv5[1], qkv5[2]

        if last:
            # only the CLS query is consumed downstream -> 1-row Q per head
            q_h = q_h[:, :, :1, :]                                   # (B,nH,1,dH)

        ctx_h = attention(q_h, k_h, v_h, add_mask, scale=scale)      # (B,nH,Tq,dH)
        tq = ctx_h.shape[2]
        # head merge (glue): (B, nH, Tq, dH) -> (B*Tq, H)
        ctx = jnp.transpose(ctx_h, (0, 2, 1, 3)).reshape(b * tq, h)

        if last:
            res_rows = x.reshape(b, s, h)[:, 0, :]                   # (B, H)
        else:
            res_rows = x                                             # (B*S, H)

        # attention output projection + residual + LayerNorm (fused epilogue)
        y = dense(ctx, layer["wo"], layer["bo"],
                  residual=res_rows, ln=(layer["ln1_g"], layer["ln1_b"]))

        # FFN
        f = dense(y, layer["w1"], layer["b1"], activation="gelu")
        if last:
            # FFN-2 + residual + LayerNorm + L2 normalize, all fused; f32 out
            return dense(f, layer["w2"], layer["b2"],
                         residual=y, ln=(layer["ln2_g"], layer["ln2_b"]),
                         l2norm=True, out_dtype=jnp.float32)         # (B, H)
        x = dense(f, layer["w2"], layer["b2"],
                  residual=y, ln=(layer["ln2_g"], layer["ln2_b"]))

    raise AssertionError("unreachable")


if __name__ == "__main__":
    cfg = Config()
    key = jax.random.PRNGKey(0)
    k_param, k_ids = jax.random.split(key)

    params = init_params(cfg, k_param)

    B, S = 2, 8
    input_ids = jax.random.randint(k_ids, (B, S), 0, cfg.vocab_size,
                                   dtype=jnp.int32)
    attention_mask = jnp.ones((B, S), dtype=jnp.int32).at[1, 6:].set(0)
    token_type_ids = jnp.zeros((B, S), dtype=jnp.int32)

    fwd = jax.jit(functools.partial(gloss_encoder_forward, cfg=cfg))
    out = fwd(params, input_ids, attention_mask, token_type_ids)
    out = jax.block_until_ready(out)

    assert out.shape == (B, cfg.hidden)
    assert out.dtype == jnp.float32
    # sanity: unit L2 norms (torch F.normalize semantics)
    norms = jnp.sqrt(jnp.sum(out * out, axis=1))
    assert jnp.allclose(norms, 1.0, atol=1e-5)
    print("KERNEL_OK")
</pallas_src>

<mosaic_0001>
module attributes {stable_mosaic.version = 11 : i64} {
  func.func @_layernorm_kernel(%arg0: i32, %arg1: memref<16x32xf32, #tpu.memory_space<vmem>>, %arg2: memref<1x32xf32, #tpu.memory_space<vmem>>, %arg3: memref<1x32xf32, #tpu.memory_space<vmem>>, %arg4: memref<16x32xbf16, #tpu.memory_space<vmem>>) attributes {dimension_semantics = [#tpu.dimension_semantics<parallel>], iteration_bounds = array<i64: 1>, scalar_prefetch = 0 : i64, scratch_operands = 0 : i64, tpu.core_type = #tpu.core_type<tc>, window_params = [{transform_indices = @transform_0, window_bounds = array<i64: 16, 32>}, {pipeline_mode = #tpu.pipeline_mode<synchronous>, transform_indices = @transform_1, window_bounds = array<i64: 1, 32>}, {pipeline_mode = #tpu.pipeline_mode<synchronous>, transform_indices = @transform_2, window_bounds = array<i64: 1, 32>}, {transform_indices = @transform_3, window_bounds = array<i64: 16, 32>}]} {
    %c0 = arith.constant 0 : index
    %c0_0 = arith.constant 0 : index
    %0 = vector.load %arg1[%c0, %c0_0] : memref<16x32xf32, #tpu.memory_space<vmem>>, vector<16x32xf32>
    %cst = arith.constant dense<0.000000e+00> : vector<16xf32>
    %1 = vector.multi_reduction <add>, %0, %cst [1] : vector<16x32xf32> to vector<16xf32>
    %2 = vector.shape_cast %1 : vector<16xf32> to vector<16x1xf32>
    %cst_1 = arith.constant 3.200000e+01 : f32
    %3 = vector.broadcast %cst_1 : f32 to vector<16x1xf32>
    %4 = arith.divf %2, %3 : vector<16x1xf32>
    %5 = vector.broadcast %4 : vector<16x1xf32> to vector<16x32xf32>
    %6 = arith.subf %0, %5 : vector<16x32xf32>
    %7 = vector.broadcast %4 : vector<16x1xf32> to vector<16x32xf32>
    %8 = arith.subf %0, %7 : vector<16x32xf32>
    %9 = arith.mulf %6, %8 : vector<16x32xf32>
    %cst_2 = arith.constant dense<0.000000e+00> : vector<16xf32>
    %10 = vector.multi_reduction <add>, %9, %cst_2 [1] : vector<16x32xf32> to vector<16xf32>
    %11 = vector.shape_cast %10 : vector<16xf32> to vector<16x1xf32>
    %cst_3 = arith.constant 3.200000e+01 : f32
    %12 = vector.broadcast %cst_3 : f32 to vector<16x1xf32>
    %13 = arith.divf %11, %12 : vector<16x1xf32>
    %14 = vector.broadcast %4 : vector<16x1xf32> to vector<16x32xf32>
    %15 = arith.subf %0, %14 : vector<16x32xf32>
    %cst_4 = arith.constant 9.99999996E-13 : f32
    %16 = vector.broadcast %cst_4 : f32 to vector<16x1xf32>
    %17 = arith.addf %13, %16 : vector<16x1xf32>
    %18 = math.rsqrt %17 : vector<16x1xf32>
    %19 = vector.broadcast %18 : vector<16x1xf32> to vector<16x32xf32>
    %20 = arith.mulf %15, %19 : vector<16x32xf32>
    %c0_5 = arith.constant 0 : index
    %c0_6 = arith.constant 0 : index
    %21 = vector.load %arg2[%c0_5, %c0_6] : memref<1x32xf32, #tpu.memory_space<vmem>>, vector<1x32xf32>
    %22 = vector.broadcast %21 : vector<1x32xf32> to vector<16x32xf32>
    %23 = arith.mulf %20, %22 : vector<16x32xf32>
    %c0_7 = arith.constant 0 : index
    %c0_8 = arith.constant 0 : index
    %24 = vector.load %arg3[%c0_7, %c0_8] : memref<1x32xf32, #tpu.memory_space<vmem>>, vector<1x32xf32>
    %25 = vector.broadcast %24 : vector<1x32xf32> to vector<16x32xf32>
    %26 = arith.addf %23, %25 : vector<16x32xf32>
    %27 = arith.truncf %26 : vector<16x32xf32> to vector<16x32xbf16>
    %c0_9 = arith.constant 0 : index
    %c0_10 = arith.constant 0 : index
    %28 = vector.load %arg4[%c0_9, %c0_10] : memref<16x32xbf16, #tpu.memory_space<vmem>>, vector<16x32xbf16>
    tpu.vector_store %arg4[%c0_9, %c0_10], %27 {strides = array<i32>} : memref<16x32xbf16, #tpu.memory_space<vmem>>, vector<16x32xbf16>,
    return
  }
  func.func @transform_0(%arg0: i32) -> (i32, i32) {
    %c0_i32 = arith.constant 0 : i32
    %c0_i32_0 = arith.constant 0 : i32
    return %arg0, %c0_i32 : i32, i32
  }
  func.func @transform_1(%arg0: i32) -> (i32, i32) {
    %c0_i32 = arith.constant 0 : i32
    %c0_i32_0 = arith.constant 0 : i32
    %c0_i32_1 = arith.constant 0 : i32
    return %c0_i32, %c0_i32_0 : i32, i32
  }
  func.func @transform_2(%arg0: i32) -> (i32, i32) {
    %c0_i32 = arith.constant 0 : i32
    %c0_i32_0 = arith.constant 0 : i32
    %c0_i32_1 = arith.constant 0 : i32
    return %c0_i32, %c0_i32_0 : i32, i32
  }
  func.func @transform_3(%arg0: i32) -> (i32, i32) {
    %c0_i32 = arith.constant 0 : i32
    %c0_i32_0 = arith.constant 0 : i32
    return %arg0, %c0_i32 : i32, i32
  }
}

module attributes {stable_mosaic.version = 11 : i64} {
  func.func @_dense_kernel(%arg0: i32, %arg1: i32, %arg2: i32, %arg3: memref<16x32xbf16, #tpu.memory_space<vmem>>, %arg4: memref<32x96xbf16, #tpu.memory_space<vmem>>, %arg5: memref<1x96xf32, #tpu.memory_space<vmem>>, %arg6: memref<16x96xbf16, #tpu.memory_space<vmem>>, %arg7: memref<16x96xf32, #tpu.memory_space<vmem>>) attributes {dimension_semantics = [#tpu.dimension_semantics<parallel>, #tpu.dimension_semantics<parallel>, #tpu.dimension_semantics<arbitrary>], iteration_bounds = array<i64: 1, 1, 1>, scalar_prefetch = 0 : i64, scratch_operands = 1 : i64, tpu.core_type = #tpu.core_type<tc>, window_params = [{transform_indices = @transform_0, window_bounds = array<i64: 16, 32>}, {transform_indices = @transform_1, window_bounds = array<i64: 32, 96>}, {transform_indices = @transform_2, window_bounds = array<i64: 1, 96>}, {transform_indices = @transform_3, window_bounds = array<i64: 16, 96>}]} {
    %c0_i32 = arith.constant 0 : i32
    %0 = arith.cmpi eq, %arg2, %c0_i32 : i32
    %1 = arith.extui %0 : i1 to i32
    %c0_i32_0 = arith.constant 0 : i32
    %2 = arith.cmpi ne, %1, %c0_i32_0 : i32
    scf.if %2 {
      %cst_10 = arith.constant 0.000000e+00 : f32
      %12 = vector.broadcast %cst_10 : f32 to vector<16x96xf32>
      %c0_11 = arith.constant 0 : index
      %c0_12 = arith.constant 0 : index
      %13 = vector.load %arg7[%c0_11, %c0_12] : memref<16x96xf32, #tpu.memory_space<vmem>>, vector<16x96xf32>
      tpu.vector_store %arg7[%c0_11, %c0_12], %12 {strides = array<i32>} : memref<16x96xf32, #tpu.memory_space<vmem>>, vector<16x96xf32>,
    } else {
    }
    %c0 = arith.constant 0 : index
    %c0_1 = arith.constant 0 : index
    %3 = vector.load %arg7[%c0, %c0_1] : memref<16x96xf32, #tpu.memory_space<vmem>>, vector<16x96xf32>
    %c0_2 = arith.constant 0 : index
    %c0_3 = arith.constant 0 : index
    %4 = vector.load %arg3[%c0_2, %c0_3] : memref<16x32xbf16, #tpu.memory_space<vmem>>, vector<16x32xbf16>
    %c0_4 = arith.constant 0 : index
    %c0_5 = arith.constant 0 : index
    %5 = vector.load %arg4[%c0_4, %c0_5] : memref<32x96xbf16, #tpu.memory_space<vmem>>, vector<32x96xbf16>
    %cst = arith.constant dense<0.000000e+00> : vector<16x96xf32>
    %6 = tpu.matmul %4, %5, %cst {dimension_numbers = #tpu.dot_dimension_numbers<[1], [0], [0], [1], [0, 0, 1, 1], [], []>} : vector<16x32xbf16>, vector<32x96xbf16>, vector<16x96xf32> -> vector<16x96xf32>
    %7 = arith.addf %3, %6 : vector<16x96xf32>
    %c0_6 = arith.constant 0 : index
    %c0_7 = arith.constant 0 : index
    %8 = vector.load %arg7[%c0_6, %c0_7] : memref<16x96xf32, #tpu.memory_space<vmem>>, vector<16x96xf32>
    tpu.vector_store %arg7[%c0_6, %c0_7], %7 {strides = array<i32>} : memref<16x96xf32, #tpu.memory_space<vmem>>, vector<16x96xf32>,
    %c0_i32_8 = arith.constant 0 : i32
    %9 = arith.cmpi eq, %arg2, %c0_i32_8 : i32
    %10 = arith.extui %9 : i1 to i32
    %c0_i32_9 = arith.constant 0 : i32
    %11 = arith.cmpi ne, %10, %c0_i32_9 : i32
    scf.if %11 {
      %c0_10 = arith.constant 0 : index
      %c0_11 = arith.constant 0 : index
      %12 = vector.load %arg7[%c0_10, %c0_11] : memref<16x96xf32, #tpu.memory_space<vmem>>, vector<16x96xf32>
      %c0_12 = arith.constant 0 : index
      %c0_13 = arith.constant 0 : index
      %13 = vector.load %arg5[%c0_12, %c0_13] : memref<1x96xf32, #tpu.memory_space<vmem>>, vector<1x96xf32>
      %14 = vector.broadcast %13 : vector<1x96xf32> to vector<16x96xf32>
      %15 = arith.addf %12, %14 : vector<16x96xf32>
      %16 = arith.truncf %15 : vector<16x96xf32> to vector<16x96xbf16>
      %c0_14 = arith.constant 0 : index
      %c0_15 = arith.constant 0 : index
      %17 = vector.load %arg6[%c0_14, %c0_15] : memref<16x96xbf16, #tpu.memory_space<vmem>>, vector<16x96xbf16>
      tpu.vector_store %arg6[%c0_14, %c0_15], %16 {strides = array<i32>} : memref<16x96xbf16, #tpu.memory_space<vmem>>, vector<16x96xbf16>,
    } else {
    }
    return
  }
  func.func @transform_0(%arg0: i32, %arg1: i32, %arg2: i32) -> (i32, i32) {
    %c0_i32 = arith.constant 0 : i32
    return %arg0, %arg2 : i32, i32
  }
  func.func @transform_1(%arg0: i32, %arg1: i32, %arg2: i32) -> (i32, i32) {
    %c0_i32 = arith.constant 0 : i32
    return %arg2, %arg1 : i32, i32
  }
  func.func @transform_2(%arg0: i32, %arg1: i32, %arg2: i32) -> (i32, i32) {
    %c0_i32 = arith.constant 0 : i32
    %c0_i32_0 = arith.constant 0 : i32
    return %c0_i32, %arg1 : i32, i32
  }
  func.func @transform_3(%arg0: i32, %arg1: i32, %arg2: i32) -> (i32, i32) {
    %c0_i32 = arith.constant 0 : i32
    return %arg0, %arg1 : i32, i32
  }
}

module attributes {stable_mosaic.version = 11 : i64} {
  func.func @_attention_kernel(%arg0: i32, %arg1: i32, %arg2: memref<1x1x8x8xbf16, #tpu.memory_space<vmem>>, %arg3: memref<1x1x8x8xbf16, #tpu.memory_space<vmem>>, %arg4: memref<1x1x8x8xbf16, #tpu.memory_space<vmem>>, %arg5: memref<1x1x8xf32, #tpu.memory_space<vmem>>, %arg6: memref<1x1x8x8xbf16, #tpu.memory_space<vmem>>) attributes {dimension_semantics = [#tpu.dimension_semantics<parallel>, #tpu.dimension_semantics<parallel>], iteration_bounds = array<i64: 2, 4>, scalar_prefetch = 0 : i64, scratch_operands = 0 : i64, tpu.core_type = #tpu.core_type<tc>, window_params = [{transform_indices = @transform_0, window_bounds = array<i64: 1, 1, 8, 8>}, {transform_indices = @transform_1, window_bounds = array<i64: 1, 1, 8, 8>}, {transform_indices = @transform_2, window_bounds = array<i64: 1, 1, 8, 8>}, {transform_indices = @transform_3, window_bounds = array<i64: 1, 1, 8>}, {transform_indices = @transform_4, window_bounds = array<i64: 1, 1, 8, 8>}]} {
    %c0 = arith.constant 0 : index
    %c0_0 = arith.constant 0 : index
    %c0_1 = arith.constant 0 : index
    %c0_2 = arith.constant 0 : index
    %0 = vector.load %arg2[%c0, %c0_0, %c0_1, %c0_2] : memref<1x1x8x8xbf16, #tpu.memory_space<vmem>>, vector<1x1x8x8xbf16>
    %1 = vector.shape_cast %0 : vector<1x1x8x8xbf16> to vector<8x8xbf16>
    %c0_3 = arith.constant 0 : index
    %c0_4 = arith.constant 0 : index
    %c0_5 = arith.constant 0 : index
    %c0_6 = arith.constant 0 : index
    %2 = vector.load %arg3[%c0_3, %c0_4, %c0_5, %c0_6] : memref<1x1x8x8xbf16, #tpu.memory_space<vmem>>, vector<1x1x8x8xbf16>
    %3 = vector.shape_cast %2 : vector<1x1x8x8xbf16> to vector<8x8xbf16>
    %c0_7 = arith.constant 0 : index
    %c0_8 = arith.constant 0 : index
    %c0_9 = arith.constant 0 : index
    %c0_10 = arith.constant 0 : index
    %4 = vector.load %arg4[%c0_7, %c0_8, %c0_9, %c0_10] : memref<1x1x8x8xbf16, #tpu.memory_space<vmem>>, vector<1x1x8x8xbf16>
    %5 = vector.shape_cast %4 : vector<1x1x8x8xbf16> to vector<8x8xbf16>
    %c0_11 = arith.constant 0 : index
    %c0_12 = arith.constant 0 : index
    %c0_13 = arith.constant 0 : index
    %6 = vector.load %arg5[%c0_11, %c0_12, %c0_13] : memref<1x1x8xf32, #tpu.memory_space<vmem>>, vector<1x1x8xf32>
    %7 = vector.shape_cast %6 : vector<1x1x8xf32> to vector<1x8xf32>
    %cst = arith.constant dense<0.000000e+00> : vector<8x8xf32>
    %8 = tpu.matmul %1, %3, %cst {dimension_numbers = #tpu.dot_dimension_numbers<[1], [1], [0], [0], [0, 0, 1, 0], [], []>} : vector<8x8xbf16>, vector<8x8xbf16>, vector<8x8xf32> -> vector<8x8xf32>
    %cst_14 = arith.constant 0.353553385 : f32
    %9 = vector.broadcast %cst_14 : f32 to vector<8x8xf32>
    %10 = arith.mulf %8, %9 : vector<8x8xf32>
    %11 = vector.broadcast %7 : vector<1x8xf32> to vector<8x8xf32>
    %12 = arith.addf %10, %11 : vector<8x8xf32>
    %cst_15 = arith.constant dense<0xFF800000> : vector<8xf32>
    %13 = vector.multi_reduction <maximumf>, %12, %cst_15 [1] : vector<8x8xf32> to vector<8xf32>
    %14 = vector.shape_cast %13 : vector<8xf32> to vector<8x1xf32>
    %15 = vector.broadcast %14 : vector<8x1xf32> to vector<8x8xf32>
    %16 = arith.subf %12, %15 : vector<8x8xf32>
    %17 = math.exp %16 : vector<8x8xf32>
    %cst_16 = arith.constant dense<0.000000e+00> : vector<8xf32>
    %18 = vector.multi_reduction <add>, %17, %cst_16 [1] : vector<8x8xf32> to vector<8xf32>
    %19 = vector.shape_cast %18 : vector<8xf32> to vector<8x1xf32>
    %20 = tpu.reciprocal %19 {approx = true} : vector<8x1xf32> -> vector<8x1xf32>
    %21 = vector.broadcast %20 : vector<8x1xf32> to vector<8x8xf32>
    %22 = arith.mulf %17, %21 : vector<8x8xf32>
    %23 = arith.truncf %22 : vector<8x8xf32> to vector<8x8xbf16>
    %cst_17 = arith.constant dense<0.000000e+00> : vector<8x8xf32>
    %24 = tpu.matmul %23, %5, %cst_17 {dimension_numbers = #tpu.dot_dimension_numbers<[1], [0], [0], [1], [0, 0, 1, 1], [], []>} : vector<8x8xbf16>, vector<8x8xbf16>, vector<8x8xf32> -> vector<8x8xf32>
    %25 = arith.truncf %24 : vector<8x8xf32> to vector<8x8xbf16>
    %c0_18 = arith.constant 0 : index
    %c0_19 = arith.constant 0 : index
    %c0_20 = arith.constant 0 : index
    %c0_21 = arith.constant 0 : index
    %26 = vector.load %arg6[%c0_18, %c0_19, %c0_20, %c0_21] : memref<1x1x8x8xbf16, #tpu.memory_space<vmem>>, vector<1x1x8x8xbf16>
    %27 = vector.shape_cast %26 : vector<1x1x8x8xbf16> to vector<8x8xbf16>
    %28 = vector.shape_cast %25 : vector<8x8xbf16> to vector<1x1x8x8xbf16>
    tpu.vector_store %arg6[%c0_18, %c0_19, %c0_20, %c0_21], %28 {strides = array<i32>} : memref<1x1x8x8xbf16, #tpu.memory_space<vmem>>, vector<1x1x8x8xbf16>,
    return
  }
  func.func @transform_0(%arg0: i32, %arg1: i32) -> (i32, i32, i32, i32) {
    %c0_i32 = arith.constant 0 : i32
    %c0_i32_0 = arith.constant 0 : i32
    %c0_i32_1 = arith.constant 0 : i32
    return %arg0, %arg1, %c0_i32, %c0_i32_0 : i32, i32, i32, i32
  }
  func.func @transform_1(%arg0: i32, %arg1: i32) -> (i32, i32, i32, i32) {
    %c0_i32 = arith.constant 0 : i32
    %c0_i32_0 = arith.constant 0 : i32
    %c0_i32_1 = arith.constant 0 : i32
    return %arg0, %arg1, %c0_i32, %c0_i32_0 : i32, i32, i32, i32
  }
  func.func @transform_2(%arg0: i32, %arg1: i32) -> (i32, i32, i32, i32) {
    %c0_i32 = arith.constant 0 : i32
    %c0_i32_0 = arith.constant 0 : i32
    %c0_i32_1 = arith.constant 0 : i32
    return %arg0, %arg1, %c0_i32, %c0_i32_0 : i32, i32, i32, i32
  }
  func.func @transform_3(%arg0: i32, %arg1: i32) -> (i32, i32, i32) {
    %c0_i32 = arith.constant 0 : i32
    %c0_i32_0 = arith.constant 0 : i32
    %c0_i32_1 = arith.constant 0 : i32
    return %arg0, %c0_i32, %c0_i32_0 : i32, i32, i32
  }
  func.func @transform_4(%arg0: i32, %arg1: i32) -> (i32, i32, i32, i32) {
    %c0_i32 = arith.constant 0 : i32
    %c0_i32_0 = arith.constant 0 : i32
    %c0_i32_1 = arith.constant 0 : i32
    return %arg0, %arg1, %c0_i32, %c0_i32_0 : i32, i32, i32, i32
  }
}

module attributes {stable_mosaic.version = 11 : i64} {
  func.func @_dense_kernel(%arg0: i32, %arg1: i32, %arg2: i32, %arg3: memref<16x32xbf16, #tpu.memory_space<vmem>>, %arg4: memref<32x32xbf16, #tpu.memory_space<vmem>>, %arg5: memref<1x32xf32, #tpu.memory_space<vmem>>, %arg6: memref<16x32xbf16, #tpu.memory_space<vmem>>, %arg7: memref<1x32xf32, #tpu.memory_space<vmem>>, %arg8: memref<1x32xf32, #tpu.memory_space<vmem>>, %arg9: memref<16x32xbf16, #tpu.memory_space<vmem>>, %arg10: memref<16x32xf32, #tpu.memory_space<vmem>>) attributes {dimension_semantics = [#tpu.dimension_semantics<parallel>, #tpu.dimension_semantics<parallel>, #tpu.dimension_semantics<arbitrary>], iteration_bounds = array<i64: 1, 1, 1>, scalar_prefetch = 0 : i64, scratch_operands = 1 : i64, tpu.core_type = #tpu.core_type<tc>, window_params = [{transform_indices = @transform_0, window_bounds = array<i64: 16, 32>}, {transform_indices = @transform_1, window_bounds = array<i64: 32, 32>}, {transform_indices = @transform_2, window_bounds = array<i64: 1, 32>}, {transform_indices = @transform_3, window_bounds = array<i64: 16, 32>}, {transform_indices = @transform_4, window_bounds = array<i64: 1, 32>}, {transform_indices = @transform_5, window_bounds = array<i64: 1, 32>}, {transform_indices = @transform_6, window_bounds = array<i64: 16, 32>}]} {
    %c0_i32 = arith.constant 0 : i32
    %0 = arith.cmpi eq, %arg2, %c0_i32 : i32
    %1 = arith.extui %0 : i1 to i32
    %c0_i32_0 = arith.constant 0 : i32
    %2 = arith.cmpi ne, %1, %c0_i32_0 : i32
    scf.if %2 {
      %cst_10 = arith.constant 0.000000e+00 : f32
      %12 = vector.broadcast %cst_10 : f32 to vector<16x32xf32>
      %c0_11 = arith.constant 0 : index
      %c0_12 = arith.constant 0 : index
      %13 = vector.load %arg10[%c0_11, %c0_12] : memref<16x32xf32, #tpu.memory_space<vmem>>, vector<16x32xf32>
      tpu.vector_store %arg10[%c0_11, %c0_12], %12 {strides = array<i32>} : memref<16x32xf32, #tpu.memory_space<vmem>>, vector<16x32xf32>,
    } else {
    }
    %c0 = arith.constant 0 : index
    %c0_1 = arith.constant 0 : index
    %3 = vector.load %arg10[%c0, %c0_1] : memref<16x32xf32, #tpu.memory_space<vmem>>, vector<16x32xf32>
    %c0_2 = arith.constant 0 : index
    %c0_3 = arith.constant 0 : index
    %4 = vector.load %arg3[%c0_2, %c0_3] : memref<16x32xbf16, #tpu.memory_space<vmem>>, vector<16x32xbf16>
    %c0_4 = arith.constant 0 : index
    %c0_5 = arith.constant 0 : index
    %5 = vector.load %arg4[%c0_4, %c0_5] : memref<32x32xbf16, #tpu.memory_space<vmem>>, vector<32x32xbf16>
    %cst = arith.constant dense<0.000000e+00> : vector<16x32xf32>
    %6 = tpu.matmul %4, %5, %cst {dimension_numbers = #tpu.dot_dimension_numbers<[1], [0], [0], [1], [0, 0, 1, 1], [], []>} : vector<16x32xbf16>, vector<32x32xbf16>, vector<16x32xf32> -> vector<16x32xf32>
    %7 = arith.addf %3, %6 : vector<16x32xf32>
    %c0_6 = arith.constant 0 : index
    %c0_7 = arith.constant 0 : index
    %8 = vector.load %arg10[%c0_6, %c0_7] : memref<16x32xf32, #tpu.memory_space<vmem>>, vector<16x32xf32>
    tpu.vector_store %arg10[%c0_6, %c0_7], %7 {strides = array<i32>} : memref<16x32xf32, #tpu.memory_space<vmem>>, vector<16x32xf32>,
    %c0_i32_8 = arith.constant 0 : i32
    %9 = arith.cmpi eq, %arg2, %c0_i32_8 : i32
    %10 = arith.extui %9 : i1 to i32
    %c0_i32_9 = arith.constant 0 : i32
    %11 = arith.cmpi ne, %10, %c0_i32_9 : i32
    scf.if %11 {
      %c0_10 = arith.constant 0 : index
      %c0_11 = arith.constant 0 : index
      %12 = vector.load %arg10[%c0_10, %c0_11] : memref<16x32xf32, #tpu.memory_space<vmem>>, vector<16x32xf32>
      %c0_12 = arith.constant 0 : index
      %c0_13 = arith.constant 0 : index
      %13 = vector.load %arg5[%c0_12, %c0_13] : memref<1x32xf32, #tpu.memory_space<vmem>>, vector<1x32xf32>
      %14 = vector.broadcast %13 : vector<1x32xf32> to vector<16x32xf32>
      %15 = arith.addf %12, %14 : vector<16x32xf32>
      %c0_14 = arith.constant 0 : index
      %c0_15 = arith.constant 0 : index
      %16 = vector.load %arg6[%c0_14, %c0_15] : memref<16x32xbf16, #tpu.memory_space<vmem>>, vector<16x32xbf16>
      %17 = arith.extf %16 : vector<16x32xbf16> to vector<16x32xf32>
      %18 = arith.addf %15, %17 : vector<16x32xf32>
      %cst_16 = arith.constant dense<0.000000e+00> : vector<16xf32>
      %19 = vector.multi_reduction <add>, %18, %cst_16 [1] : vector<16x32xf32> to vector<16xf32>
      %20 = vector.shape_cast %19 : vector<16xf32> to vector<16x1xf32>
      %cst_17 = arith.constant 3.200000e+01 : f32
      %21 = vector.broadcast %cst_17 : f32 to vector<16x1xf32>
      %22 = arith.divf %20, %21 : vector<16x1xf32>
      %23 = vector.broadcast %22 : vector<16x1xf32> to vector<16x32xf32>
      %24 = arith.subf %18, %23 : vector<16x32xf32>
      %25 = vector.broadcast %22 : vector<16x1xf32> to vector<16x32xf32>
      %26 = arith.subf %18, %25 : vector<16x32xf32>
      %27 = arith.mulf %24, %26 : vector<16x32xf32>
      %cst_18 = arith.constant dense<0.000000e+00> : vector<16xf32>
      %28 = vector.multi_reduction <add>, %27, %cst_18 [1] : vector<16x32xf32> to vector<16xf32>
      %29 = vector.shape_cast %28 : vector<16xf32> to vector<16x1xf32>
      %cst_19 = arith.constant 3.200000e+01 : f32
      %30 = vector.broadcast %cst_19 : f32 to vector<16x1xf32>
      %31 = arith.divf %29, %30 : vector<16x1xf32>
      %32 = vector.broadcast %22 : vector<16x1xf32> to vector<16x32xf32>
      %33 = arith.subf %18, %32 : vector<16x32xf32>
      %cst_20 = arith.constant 9.99999996E-13 : f32
      %34 = vector.broadcast %cst_20 : f32 to vector<16x1xf32>
      %35 = arith.addf %31, %34 : vector<16x1xf32>
      %36 = math.rsqrt %35 : vector<16x1xf32>
      %37 = vector.broadcast %36 : vector<16x1xf32> to vector<16x32xf32>
      %38 = arith.mulf %33, %37 : vector<16x32xf32>
      %c0_21 = arith.constant 0 : index
      %c0_22 = arith.constant 0 : index
      %39 = vector.load %arg7[%c0_21, %c0_22] : memref<1x32xf32, #tpu.memory_space<vmem>>, vector<1x32xf32>
      %40 = vector.broadcast %39 : vector<1x32xf32> to vector<16x32xf32>
      %41 = arith.mulf %38, %40 : vector<16x32xf32>
      %c0_23 = arith.constant 0 : index
      %c0_24 = arith.constant 0 : index
      %42 = vector.load %arg8[%c0_23, %c0_24] : memref<1x32xf32, #tpu.memory_space<vmem>>, vector<1x32xf32>
      %43 = vector.broadcast %42 : vector<1x32xf32> to vector<16x32xf32>
      %44 = arith.addf %41, %43 : vector<16x32xf32>
      %45 = arith.truncf %44 : vector<16x32xf32> to vector<16x32xbf16>
      %c0_25 = arith.constant 0 : index
      %c0_26 = arith.constant 0 : index
      %46 = vector.load %arg9[%c0_25, %c0_26] : memref<16x32xbf16, #tpu.memory_space<vmem>>, vector<16x32xbf16>
      tpu.vector_store %arg9[%c0_25, %c0_26], %45 {strides = array<i32>} : memref<16x32xbf16, #tpu.memory_space<vmem>>, vector<16x32xbf16>,
    } else {
    }
    return
  }
  func.func @transform_0(%arg0: i32, %arg1: i32, %arg2: i32) -> (i32, i32) {
    %c0_i32 = arith.constant 0 : i32
    return %arg0, %arg2 : i32, i32
  }
  func.func @transform_1(%arg0: i32, %arg1: i32, %arg2: i32) -> (i32, i32) {
    %c0_i32 = arith.constant 0 : i32
    return %arg2, %arg1 : i32, i32
  }
  func.func @transform_2(%arg0: i32, %arg1: i32, %arg2: i32) -> (i32, i32) {
    %c0_i32 = arith.constant 0 : i32
    %c0_i32_0 = arith.constant 0 : i32
    return %c0_i32, %arg1 : i32, i32
  }
  func.func @transform_3(%arg0: i32, %arg1: i32, %arg2: i32) -> (i32, i32) {
    %c0_i32 = arith.constant 0 : i32
    return %arg0, %arg1 : i32, i32
  }
  func.func @transform_4(%arg0: i32, %arg1: i32, %arg2: i32) -> (i32, i32) {
    %c0_i32 = arith.constant 0 : i32
    %c0_i32_0 = arith.constant 0 : i32
    return %c0_i32, %arg1 : i32, i32
  }
  func.func @transform_5(%arg0: i32, %arg1: i32, %arg2: i32) -> (i32, i32) {
    %c0_i32 = arith.constant 0 : i32
    %c0_i32_0 = arith.constant 0 : i32
    return %c0_i32, %arg1 : i32, i32
  }
  func.func @transform_6(%arg0: i32, %arg1: i32, %arg2: i32) -> (i32, i32) {
    %c0_i32 = arith.constant 0 : i32
    return %arg0, %arg1 : i32, i32
  }
}

module attributes {stable_mosaic.version = 11 : i64} {
  func.func @_dense_kernel(%arg0: i32, %arg1: i32, %arg2: i32, %arg3: memref<16x32xbf16, #tpu.memory_space<vmem>>, %arg4: memref<32x64xbf16, #tpu.memory_space<vmem>>, %arg5: memref<1x64xf32, #tpu.memory_space<vmem>>, %arg6: memref<16x64xbf16, #tpu.memory_space<vmem>>, %arg7: memref<16x64xf32, #tpu.memory_space<vmem>>) attributes {dimension_semantics = [#tpu.dimension_semantics<parallel>, #tpu.dimension_semantics<parallel>, #tpu.dimension_semantics<arbitrary>], iteration_bounds = array<i64: 1, 1, 1>, scalar_prefetch = 0 : i64, scratch_operands = 1 : i64, tpu.core_type = #tpu.core_type<tc>, window_params = [{transform_indices = @transform_0, window_bounds = array<i64: 16, 32>}, {transform_indices = @transform_1, window_bounds = array<i64: 32, 64>}, {transform_indices = @transform_2, window_bounds = array<i64: 1, 64>}, {transform_indices = @transform_3, window_bounds = array<i64: 16, 64>}]} {
    %c0_i32 = arith.constant 0 : i32
    %0 = arith.cmpi eq, %arg2, %c0_i32 : i32
    %1 = arith.extui %0 : i1 to i32
    %c0_i32_0 = arith.constant 0 : i32
    %2 = arith.cmpi ne, %1, %c0_i32_0 : i32
    scf.if %2 {
      %cst_10 = arith.constant 0.000000e+00 : f32
      %12 = vector.broadcast %cst_10 : f32 to vector<16x64xf32>
      %c0_11 = arith.constant 0 : index
      %c0_12 = arith.constant 0 : index
      %13 = vector.load %arg7[%c0_11, %c0_12] : memref<16x64xf32, #tpu.memory_space<vmem>>, vector<16x64xf32>
      tpu.vector_store %arg7[%c0_11, %c0_12], %12 {strides = array<i32>} : memref<16x64xf32, #tpu.memory_space<vmem>>, vector<16x64xf32>,
    } else {
    }
    %c0 = arith.constant 0 : index
    %c0_1 = arith.constant 0 : index
    %3 = vector.load %arg7[%c0, %c0_1] : memref<16x64xf32, #tpu.memory_space<vmem>>, vector<16x64xf32>
    %c0_2 = arith.constant 0 : index
    %c0_3 = arith.constant 0 : index
    %4 = vector.load %arg3[%c0_2, %c0_3] : memref<16x32xbf16, #tpu.memory_space<vmem>>, vector<16x32xbf16>
    %c0_4 = arith.constant 0 : index
    %c0_5 = arith.constant 0 : index
    %5 = vector.load %arg4[%c0_4, %c0_5] : memref<32x64xbf16, #tpu.memory_space<vmem>>, vector<32x64xbf16>
    %cst = arith.constant dense<0.000000e+00> : vector<16x64xf32>
    %6 = tpu.matmul %4, %5, %cst {dimension_numbers = #tpu.dot_dimension_numbers<[1], [0], [0], [1], [0, 0, 1, 1], [], []>} : vector<16x32xbf16>, vector<32x64xbf16>, vector<16x64xf32> -> vector<16x64xf32>
    %7 = arith.addf %3, %6 : vector<16x64xf32>
    %c0_6 = arith.constant 0 : index
    %c0_7 = arith.constant 0 : index
    %8 = vector.load %arg7[%c0_6, %c0_7] : memref<16x64xf32, #tpu.memory_space<vmem>>, vector<16x64xf32>
    tpu.vector_store %arg7[%c0_6, %c0_7], %7 {strides = array<i32>} : memref<16x64xf32, #tpu.memory_space<vmem>>, vector<16x64xf32>,
    %c0_i32_8 = arith.constant 0 : i32
    %9 = arith.cmpi eq, %arg2, %c0_i32_8 : i32
    %10 = arith.extui %9 : i1 to i32
    %c0_i32_9 = arith.constant 0 : i32
    %11 = arith.cmpi ne, %10, %c0_i32_9 : i32
    scf.if %11 {
      %c0_10 = arith.constant 0 : index
      %c0_11 = arith.constant 0 : index
      %12 = vector.load %arg7[%c0_10, %c0_11] : memref<16x64xf32, #tpu.memory_space<vmem>>, vector<16x64xf32>
      %c0_12 = arith.constant 0 : index
      %c0_13 = arith.constant 0 : index
      %13 = vector.load %arg5[%c0_12, %c0_13] : memref<1x64xf32, #tpu.memory_space<vmem>>, vector<1x64xf32>
      %14 = vector.broadcast %13 : vector<1x64xf32> to vector<16x64xf32>
      %15 = arith.addf %12, %14 : vector<16x64xf32>
      %cst_14 = arith.constant 5.000000e-01 : f32
      %16 = vector.broadcast %cst_14 : f32 to vector<16x64xf32>
      %17 = arith.mulf %16, %15 : vector<16x64xf32>
      %cst_15 = arith.constant 4.471500e-02 : f32
      %18 = vector.broadcast %cst_15 : f32 to vector<16x64xf32>
      %19 = arith.mulf %18, %15 : vector<16x64xf32>
      %20 = arith.mulf %19, %15 : vector<16x64xf32>
      %21 = arith.mulf %20, %15 : vector<16x64xf32>
      %22 = arith.addf %15, %21 : vector<16x64xf32>
      %cst_16 = arith.constant 0.797884583 : f32
      %23 = vector.broadcast %cst_16 : f32 to vector<16x64xf32>
      %24 = arith.mulf %23, %22 : vector<16x64xf32>
      %25 = math.tanh %24 : vector<16x64xf32>
      %cst_17 = arith.constant 1.000000e+00 : f32
      %26 = vector.broadcast %cst_17 : f32 to vector<16x64xf32>
      %27 = arith.addf %26, %25 : vector<16x64xf32>
      %28 = arith.mulf %17, %27 : vector<16x64xf32>
      %29 = arith.truncf %28 : vector<16x64xf32> to vector<16x64xbf16>
      %c0_18 = arith.constant 0 : index
      %c0_19 = arith.constant 0 : index
      %30 = vector.load %arg6[%c0_18, %c0_19] : memref<16x64xbf16, #tpu.memory_space<vmem>>, vector<16x64xbf16>
      tpu.vector_store %arg6[%c0_18, %c0_19], %29 {strides = array<i32>} : memref<16x64xbf16, #tpu.memory_space<vmem>>, vector<16x64xbf16>,
    } else {
    }
    return
  }
  func.func @transform_0(%arg0: i32, %arg1: i32, %arg2: i32) -> (i32, i32) {
    %c0_i32 = arith.constant 0 : i32
    return %arg0, %arg2 : i32, i32
  }
  func.func @transform_1(%arg0: i32, %arg1: i32, %arg2: i32) -> (i32, i32) {
    %c0_i32 = arith.constant 0 : i32
    return %arg2, %arg1 : i32, i32
  }
  func.func @transform_2(%arg0: i32, %arg1: i32, %arg2: i32) -> (i32, i32) {
    %c0_i32 = arith.constant 0 : i32
    %c0_i32_0 = arith.constant 0 : i32
    return %c0_i32, %arg1 : i32, i32
  }
  func.func @transform_3(%arg0: i32, %arg1: i32, %arg2: i32) -> (i32, i32) {
    %c0_i32 = arith.constant 0 : i32
    return %arg0, %arg1 : i32, i32
  }
}

module attributes {stable_mosaic.version = 11 : i64} {
  func.func @_dense_kernel(%arg0: i32, %arg1: i32, %arg2: i32, %arg3: memref<16x64xbf16, #tpu.memory_space<vmem>>, %arg4: memref<64x32xbf16, #tpu.memory_space<vmem>>, %arg5: memref<1x32xf32, #tpu.memory_space<vmem>>, %arg6: memref<16x32xbf16, #tpu.memory_space<vmem>>, %arg7: memref<1x32xf32, #tpu.memory_space<vmem>>, %arg8: memref<1x32xf32, #tpu.memory_space<vmem>>, %arg9: memref<16x32xbf16, #tpu.memory_space<vmem>>, %arg10: memref<16x32xf32, #tpu.memory_space<vmem>>) attributes {dimension_semantics = [#tpu.dimension_semantics<parallel>, #tpu.dimension_semantics<parallel>, #tpu.dimension_semantics<arbitrary>], iteration_bounds = array<i64: 1, 1, 1>, scalar_prefetch = 0 : i64, scratch_operands = 1 : i64, tpu.core_type = #tpu.core_type<tc>, window_params = [{transform_indices = @transform_0, window_bounds = array<i64: 16, 64>}, {transform_indices = @transform_1, window_bounds = array<i64: 64, 32>}, {transform_indices = @transform_2, window_bounds = array<i64: 1, 32>}, {transform_indices = @transform_3, window_bounds = array<i64: 16, 32>}, {transform_indices = @transform_4, window_bounds = array<i64: 1, 32>}, {transform_indices = @transform_5, window_bounds = array<i64: 1, 32>}, {transform_indices = @transform_6, window_bounds = array<i64: 16, 32>}]} {
    %c0_i32 = arith.constant 0 : i32
    %0 = arith.cmpi eq, %arg2, %c0_i32 : i32
    %1 = arith.extui %0 : i1 to i32
    %c0_i32_0 = arith.constant 0 : i32
    %2 = arith.cmpi ne, %1, %c0_i32_0 : i32
    scf.if %2 {
      %cst_10 = arith.constant 0.000000e+00 : f32
      %12 = vector.broadcast %cst_10 : f32 to vector<16x32xf32>
      %c0_11 = arith.constant 0 : index
      %c0_12 = arith.constant 0 : index
      %13 = vector.load %arg10[%c0_11, %c0_12] : memref<16x32xf32, #tpu.memory_space<vmem>>, vector<16x32xf32>
      tpu.vector_store %arg10[%c0_11, %c0_12], %12 {strides = array<i32>} : memref<16x32xf32, #tpu.memory_space<vmem>>, vector<16x32xf32>,
    } else {
    }
    %c0 = arith.constant 0 : index
    %c0_1 = arith.constant 0 : index
    %3 = vector.load %arg10[%c0, %c0_1] : memref<16x32xf32, #tpu.memory_space<vmem>>, vector<16x32xf32>
    %c0_2 = arith.constant 0 : index
    %c0_3 = arith.constant 0 : index
    %4 = vector.load %arg3[%c0_2, %c0_3] : memref<16x64xbf16, #tpu.memory_space<vmem>>, vector<16x64xbf16>
    %c0_4 = arith.constant 0 : index
    %c0_5 = arith.constant 0 : index
    %5 = vector.load %arg4[%c0_4, %c0_5] : memref<64x32xbf16, #tpu.memory_space<vmem>>, vector<64x32xbf16>
    %cst = arith.constant dense<0.000000e+00> : vector<16x32xf32>
    %6 = tpu.matmul %4, %5, %cst {dimension_numbers = #tpu.dot_dimension_numbers<[1], [0], [0], [1], [0, 0, 1, 1], [], []>} : vector<16x64xbf16>, vector<64x32xbf16>, vector<16x32xf32> -> vector<16x32xf32>
    %7 = arith.addf %3, %6 : vector<16x32xf32>
    %c0_6 = arith.constant 0 : index
    %c0_7 = arith.constant 0 : index
    %8 = vector.load %arg10[%c0_6, %c0_7] : memref<16x32xf32, #tpu.memory_space<vmem>>, vector<16x32xf32>
    tpu.vector_store %arg10[%c0_6, %c0_7], %7 {strides = array<i32>} : memref<16x32xf32, #tpu.memory_space<vmem>>, vector<16x32xf32>,
    %c0_i32_8 = arith.constant 0 : i32
    %9 = arith.cmpi eq, %arg2, %c0_i32_8 : i32
    %10 = arith.extui %9 : i1 to i32
    %c0_i32_9 = arith.constant 0 : i32
    %11 = arith.cmpi ne, %10, %c0_i32_9 : i32
    scf.if %11 {
      %c0_10 = arith.constant 0 : index
      %c0_11 = arith.constant 0 : index
      %12 = vector.load %arg10[%c0_10, %c0_11] : memref<16x32xf32, #tpu.memory_space<vmem>>, vector<16x32xf32>
      %c0_12 = arith.constant 0 : index
      %c0_13 = arith.constant 0 : index
      %13 = vector.load %arg5[%c0_12, %c0_13] : memref<1x32xf32, #tpu.memory_space<vmem>>, vector<1x32xf32>
      %14 = vector.broadcast %13 : vector<1x32xf32> to vector<16x32xf32>
      %15 = arith.addf %12, %14 : vector<16x32xf32>
      %c0_14 = arith.constant 0 : index
      %c0_15 = arith.constant 0 : index
      %16 = vector.load %arg6[%c0_14, %c0_15] : memref<16x32xbf16, #tpu.memory_space<vmem>>, vector<16x32xbf16>
      %17 = arith.extf %16 : vector<16x32xbf16> to vector<16x32xf32>
      %18 = arith.addf %15, %17 : vector<16x32xf32>
      %cst_16 = arith.constant dense<0.000000e+00> : vector<16xf32>
      %19 = vector.multi_reduction <add>, %18, %cst_16 [1] : vector<16x32xf32> to vector<16xf32>
      %20 = vector.shape_cast %19 : vector<16xf32> to vector<16x1xf32>
      %cst_17 = arith.constant 3.200000e+01 : f32
      %21 = vector.broadcast %cst_17 : f32 to vector<16x1xf32>
      %22 = arith.divf %20, %21 : vector<16x1xf32>
      %23 = vector.broadcast %22 : vector<16x1xf32> to vector<16x32xf32>
      %24 = arith.subf %18, %23 : vector<16x32xf32>
      %25 = vector.broadcast %22 : vector<16x1xf32> to vector<16x32xf32>
      %26 = arith.subf %18, %25 : vector<16x32xf32>
      %27 = arith.mulf %24, %26 : vector<16x32xf32>
      %cst_18 = arith.constant dense<0.000000e+00> : vector<16xf32>
      %28 = vector.multi_reduction <add>, %27, %cst_18 [1] : vector<16x32xf32> to vector<16xf32>
      %29 = vector.shape_cast %28 : vector<16xf32> to vector<16x1xf32>
      %cst_19 = arith.constant 3.200000e+01 : f32
      %30 = vector.broadcast %cst_19 : f32 to vector<16x1xf32>
      %31 = arith.divf %29, %30 : vector<16x1xf32>
      %32 = vector.broadcast %22 : vector<16x1xf32> to vector<16x32xf32>
      %33 = arith.subf %18, %32 : vector<16x32xf32>
      %cst_20 = arith.constant 9.99999996E-13 : f32
      %34 = vector.broadcast %cst_20 : f32 to vector<16x1xf32>
      %35 = arith.addf %31, %34 : vector<16x1xf32>
      %36 = math.rsqrt %35 : vector<16x1xf32>
      %37 = vector.broadcast %36 : vector<16x1xf32> to vector<16x32xf32>
      %38 = arith.mulf %33, %37 : vector<16x32xf32>
      %c0_21 = arith.constant 0 : index
      %c0_22 = arith.constant 0 : index
      %39 = vector.load %arg7[%c0_21, %c0_22] : memref<1x32xf32, #tpu.memory_space<vmem>>, vector<1x32xf32>
      %40 = vector.broadcast %39 : vector<1x32xf32> to vector<16x32xf32>
      %41 = arith.mulf %38, %40 : vector<16x32xf32>
      %c0_23 = arith.constant 0 : index
      %c0_24 = arith.constant 0 : index
      %42 = vector.load %arg8[%c0_23, %c0_24] : memref<1x32xf32, #tpu.memory_space<vmem>>, vector<1x32xf32>
      %43 = vector.broadcast %42 : vector<1x32xf32> to vector<16x32xf32>
      %44 = arith.addf %41, %43 : vector<16x32xf32>
      %45 = arith.truncf %44 : vector<16x32xf32> to vector<16x32xbf16>
      %c0_25 = arith.constant 0 : index
      %c0_26 = arith.constant 0 : index
      %46 = vector.load %arg9[%c0_25, %c0_26] : memref<16x32xbf16, #tpu.memory_space<vmem>>, vector<16x32xbf16>
      tpu.vector_store %arg9[%c0_25, %c0_26], %45 {strides = array<i32>} : memref<16x32xbf16, #tpu.memory_space<vmem>>, vector<16x32xbf16>,
    } else {
    }
    return
  }
  func.func @transform_0(%arg0: i32, %arg1: i32, %arg2: i32) -> (i32, i32) {
    %c0_i32 = arith.constant 0 : i32
    return %arg0, %arg2 : i32, i32
  }
  func.func @transform_1(%arg0: i32, %arg1: i32, %arg2: i32) -> (i32, i32) {
    %c0_i32 = arith.constant 0 : i32
    return %arg2, %arg1 : i32, i32
  }
  func.func @transform_2(%arg0: i32, %arg1: i32, %arg2: i32) -> (i32, i32) {
    %c0_i32 = arith.constant 0 : i32
    %c0_i32_0 = arith.constant 0 : i32
    return %c0_i32, %arg1 : i32, i32
  }
  func.func @transform_3(%arg0: i32, %arg1: i32, %arg2: i32) -> (i32, i32) {
    %c0_i32 = arith.constant 0 : i32
    return %arg0, %arg1 : i32, i32
  }
  func.func @transform_4(%arg0: i32, %arg1: i32, %arg2: i32) -> (i32, i32) {
    %c0_i32 = arith.constant 0 : i32
    %c0_i32_0 = arith.constant 0 : i32
    return %c0_i32, %arg1 : i32, i32
  }
  func.func @transform_5(%arg0: i32, %arg1: i32, %arg2: i32) -> (i32, i32) {
    %c0_i32 = arith.constant 0 : i32
    %c0_i32_0 = arith.constant 0 : i32
    return %c0_i32, %arg1 : i32, i32
  }
  func.func @transform_6(%arg0: i32, %arg1: i32, %arg2: i32) -> (i32, i32) {
    %c0_i32 = arith.constant 0 : i32
    return %arg0, %arg1 : i32, i32
  }
}

module attributes {stable_mosaic.version = 11 : i64} {
  func.func @_attention_kernel(%arg0: i32, %arg1: i32, %arg2: memref<1x1x1x8xbf16, #tpu.memory_space<vmem>>, %arg3: memref<1x1x8x8xbf16, #tpu.memory_space<vmem>>, %arg4: memref<1x1x8x8xbf16, #tpu.memory_space<vmem>>, %arg5: memref<1x1x8xf32, #tpu.memory_space<vmem>>, %arg6: memref<1x1x1x8xbf16, #tpu.memory_space<vmem>>) attributes {dimension_semantics = [#tpu.dimension_semantics<parallel>, #tpu.dimension_semantics<parallel>], iteration_bounds = array<i64: 2, 4>, scalar_prefetch = 0 : i64, scratch_operands = 0 : i64, tpu.core_type = #tpu.core_type<tc>, window_params = [{transform_indices = @transform_0, window_bounds = array<i64: 1, 1, 1, 8>}, {transform_indices = @transform_1, window_bounds = array<i64: 1, 1, 8, 8>}, {transform_indices = @transform_2, window_bounds = array<i64: 1, 1, 8, 8>}, {transform_indices = @transform_3, window_bounds = array<i64: 1, 1, 8>}, {transform_indices = @transform_4, window_bounds = array<i64: 1, 1, 1, 8>}]} {
    %c0 = arith.constant 0 : index
    %c0_0 = arith.constant 0 : index
    %c0_1 = arith.constant 0 : index
    %c0_2 = arith.constant 0 : index
    %0 = vector.load %arg2[%c0, %c0_0, %c0_1, %c0_2] : memref<1x1x1x8xbf16, #tpu.memory_space<vmem>>, vector<1x1x1x8xbf16>
    %1 = vector.shape_cast %0 : vector<1x1x1x8xbf16> to vector<1x8xbf16>
    %c0_3 = arith.constant 0 : index
    %c0_4 = arith.constant 0 : index
    %c0_5 = arith.constant 0 : index
    %c0_6 = arith.constant 0 : index
    %2 = vector.load %arg3[%c0_3, %c0_4, %c0_5, %c0_6] : memref<1x1x8x8xbf16, #tpu.memory_space<vmem>>, vector<1x1x8x8xbf16>
    %3 = vector.shape_cast %2 : vector<1x1x8x8xbf16> to vector<8x8xbf16>
    %c0_7 = arith.constant 0 : index
    %c0_8 = arith.constant 0 : index
    %c0_9 = arith.constant 0 : index
    %c0_10 = arith.constant 0 : index
    %4 = vector.load %arg4[%c0_7, %c0_8, %c0_9, %c0_10] : memref<1x1x8x8xbf16, #tpu.memory_space<vmem>>, vector<1x1x8x8xbf16>
    %5 = vector.shape_cast %4 : vector<1x1x8x8xbf16> to vector<8x8xbf16>
    %c0_11 = arith.constant 0 : index
    %c0_12 = arith.constant 0 : index
    %c0_13 = arith.constant 0 : index
    %6 = vector.load %arg5[%c0_11, %c0_12, %c0_13] : memref<1x1x8xf32, #tpu.memory_space<vmem>>, vector<1x1x8xf32>
    %7 = vector.shape_cast %6 : vector<1x1x8xf32> to vector<1x8xf32>
    %cst = arith.constant dense<0.000000e+00> : vector<1x8xf32>
    %8 = tpu.matmul %1, %3, %cst {dimension_numbers = #tpu.dot_dimension_numbers<[1], [1], [0], [0], [0, 0, 1, 0], [], []>} : vector<1x8xbf16>, vector<8x8xbf16>, vector<1x8xf32> -> vector<1x8xf32>
    %cst_14 = arith.constant 0.353553385 : f32
    %9 = vector.broadcast %cst_14 : f32 to vector<1x8xf32>
    %10 = arith.mulf %8, %9 : vector<1x8xf32>
    %11 = arith.addf %10, %7 : vector<1x8xf32>
    %cst_15 = arith.constant dense<0xFF800000> : vector<1xf32>
    %12 = vector.multi_reduction <maximumf>, %11, %cst_15 [1] : vector<1x8xf32> to vector<1xf32>
    %13 = vector.shape_cast %12 : vector<1xf32> to vector<1x1xf32>
    %14 = vector.broadcast %13 : vector<1x1xf32> to vector<1x8xf32>
    %15 = arith.subf %11, %14 : vector<1x8xf32>
    %16 = math.exp %15 : vector<1x8xf32>
    %cst_16 = arith.constant dense<0.000000e+00> : vector<1xf32>
    %17 = vector.multi_reduction <add>, %16, %cst_16 [1] : vector<1x8xf32> to vector<1xf32>
    %18 = vector.shape_cast %17 : vector<1xf32> to vector<1x1xf32>
    %19 = tpu.reciprocal %18 {approx = true} : vector<1x1xf32> -> vector<1x1xf32>
    %20 = vector.broadcast %19 : vector<1x1xf32> to vector<1x8xf32>
    %21 = arith.mulf %16, %20 : vector<1x8xf32>
    %22 = arith.truncf %21 : vector<1x8xf32> to vector<1x8xbf16>
    %cst_17 = arith.constant dense<0.000000e+00> : vector<1x8xf32>
    %23 = tpu.matmul %22, %5, %cst_17 {dimension_numbers = #tpu.dot_dimension_numbers<[1], [0], [0], [1], [0, 0, 1, 1], [], []>} : vector<1x8xbf16>, vector<8x8xbf16>, vector<1x8xf32> -> vector<1x8xf32>
    %24 = arith.truncf %23 : vector<1x8xf32> to vector<1x8xbf16>
    %c0_18 = arith.constant 0 : index
    %c0_19 = arith.constant 0 : index
    %c0_20 = arith.constant 0 : index
    %c0_21 = arith.constant 0 : index
    %25 = vector.load %arg6[%c0_18, %c0_19, %c0_20, %c0_21] : memref<1x1x1x8xbf16, #tpu.memory_space<vmem>>, vector<1x1x1x8xbf16>
    %26 = vector.shape_cast %25 : vector<1x1x1x8xbf16> to vector<1x8xbf16>
    %27 = vector.shape_cast %24 : vector<1x8xbf16> to vector<1x1x1x8xbf16>
    tpu.vector_store %arg6[%c0_18, %c0_19, %c0_20, %c0_21], %27 {strides = array<i32>} : memref<1x1x1x8xbf16, #tpu.memory_space<vmem>>, vector<1x1x1x8xbf16>,
    return
  }
  func.func @transform_0(%arg0: i32, %arg1: i32) -> (i32, i32, i32, i32) {
    %c0_i32 = arith.constant 0 : i32
    %c0_i32_0 = arith.constant 0 : i32
    %c0_i32_1 = arith.constant 0 : i32
    return %arg0, %arg1, %c0_i32, %c0_i32_0 : i32, i32, i32, i32
  }
  func.func @transform_1(%arg0: i32, %arg1: i32) -> (i32, i32, i32, i32) {
    %c0_i32 = arith.constant 0 : i32
    %c0_i32_0 = arith.constant 0 : i32
    %c0_i32_1 = arith.constant 0 : i32
    return %arg0, %arg1, %c0_i32, %c0_i32_0 : i32, i32, i32, i32
  }
  func.func @transform_2(%arg0: i32, %arg1: i32) -> (i32, i32, i32, i32) {
    %c0_i32 = arith.constant 0 : i32
    %c0_i32_0 = arith.constant 0 : i32
    %c0_i32_1 = arith.constant 0 : i32
    return %arg0, %arg1, %c0_i32, %c0_i32_0 : i32, i32, i32, i32
  }
  func.func @transform_3(%arg0: i32, %arg1: i32) -> (i32, i32, i32) {
    %c0_i32 = arith.constant 0 : i32
    %c0_i32_0 = arith.constant 0 : i32
    %c0_i32_1 = arith.constant 0 : i32
    return %arg0, %c0_i32, %c0_i32_0 : i32, i32, i32
  }
  func.func @transform_4(%arg0: i32, %arg1: i32) -> (i32, i32, i32, i32) {
    %c0_i32 = arith.constant 0 : i32
    %c0_i32_0 = arith.constant 0 : i32
    %c0_i32_1 = arith.constant 0 : i32
    return %arg0, %arg1, %c0_i32, %c0_i32_0 : i32, i32, i32, i32
  }
}

module attributes {stable_mosaic.version = 11 : i64} {
  func.func @_dense_kernel(%arg0: i32, %arg1: i32, %arg2: i32, %arg3: memref<2x32xbf16, #tpu.memory_space<vmem>>, %arg4: memref<32x32xbf16, #tpu.memory_space<vmem>>, %arg5: memref<1x32xf32, #tpu.memory_space<vmem>>, %arg6: memref<2x32xbf16, #tpu.memory_space<vmem>>, %arg7: memref<1x32xf32, #tpu.memory_space<vmem>>, %arg8: memref<1x32xf32, #tpu.memory_space<vmem>>, %arg9: memref<2x32xbf16, #tpu.memory_space<vmem>>, %arg10: memref<2x32xf32, #tpu.memory_space<vmem>>) attributes {dimension_semantics = [#tpu.dimension_semantics<parallel>, #tpu.dimension_semantics<parallel>, #tpu.dimension_semantics<arbitrary>], iteration_bounds = array<i64: 1, 1, 1>, scalar_prefetch = 0 : i64, scratch_operands = 1 : i64, tpu.core_type = #tpu.core_type<tc>, window_params = [{transform_indices = @transform_0, window_bounds = array<i64: 2, 32>}, {transform_indices = @transform_1, window_bounds = array<i64: 32, 32>}, {transform_indices = @transform_2, window_bounds = array<i64: 1, 32>}, {transform_indices = @transform_3, window_bounds = array<i64: 2, 32>}, {transform_indices = @transform_4, window_bounds = array<i64: 1, 32>}, {transform_indices = @transform_5, window_bounds = array<i64: 1, 32>}, {transform_indices = @transform_6, window_bounds = array<i64: 2, 32>}]} {
    %c0_i32 = arith.constant 0 : i32
    %0 = arith.cmpi eq, %arg2, %c0_i32 : i32
    %1 = arith.extui %0 : i1 to i32
    %c0_i32_0 = arith.constant 0 : i32
    %2 = arith.cmpi ne, %1, %c0_i32_0 : i32
    scf.if %2 {
      %cst_10 = arith.constant 0.000000e+00 : f32
      %12 = vector.broadcast %cst_10 : f32 to vector<2x32xf32>
      %c0_11 = arith.constant 0 : index
      %c0_12 = arith.constant 0 : index
      %13 = vector.load %arg10[%c0_11, %c0_12] : memref<2x32xf32, #tpu.memory_space<vmem>>, vector<2x32xf32>
      tpu.vector_store %arg10[%c0_11, %c0_12], %12 {strides = array<i32>} : memref<2x32xf32, #tpu.memory_space<vmem>>, vector<2x32xf32>,
    } else {
    }
    %c0 = arith.constant 0 : index
    %c0_1 = arith.constant 0 : index
    %3 = vector.load %arg10[%c0, %c0_1] : memref<2x32xf32, #tpu.memory_space<vmem>>, vector<2x32xf32>
    %c0_2 = arith.constant 0 : index
    %c0_3 = arith.constant 0 : index
    %4 = vector.load %arg3[%c0_2, %c0_3] : memref<2x32xbf16, #tpu.memory_space<vmem>>, vector<2x32xbf16>
    %c0_4 = arith.constant 0 : index
    %c0_5 = arith.constant 0 : index
    %5 = vector.load %arg4[%c0_4, %c0_5] : memref<32x32xbf16, #tpu.memory_space<vmem>>, vector<32x32xbf16>
    %cst = arith.constant dense<0.000000e+00> : vector<2x32xf32>
    %6 = tpu.matmul %4, %5, %cst {dimension_numbers = #tpu.dot_dimension_numbers<[1], [0], [0], [1], [0, 0, 1, 1], [], []>} : vector<2x32xbf16>, vector<32x32xbf16>, vector<2x32xf32> -> vector<2x32xf32>
    %7 = arith.addf %3, %6 : vector<2x32xf32>
    %c0_6 = arith.constant 0 : index
    %c0_7 = arith.constant 0 : index
    %8 = vector.load %arg10[%c0_6, %c0_7] : memref<2x32xf32, #tpu.memory_space<vmem>>, vector<2x32xf32>
    tpu.vector_store %arg10[%c0_6, %c0_7], %7 {strides = array<i32>} : memref<2x32xf32, #tpu.memory_space<vmem>>, vector<2x32xf32>,
    %c0_i32_8 = arith.constant 0 : i32
    %9 = arith.cmpi eq, %arg2, %c0_i32_8 : i32
    %10 = arith.extui %9 : i1 to i32
    %c0_i32_9 = arith.constant 0 : i32
    %11 = arith.cmpi ne, %10, %c0_i32_9 : i32
    scf.if %11 {
      %c0_10 = arith.constant 0 : index
      %c0_11 = arith.constant 0 : index
      %12 = vector.load %arg10[%c0_10, %c0_11] : memref<2x32xf32, #tpu.memory_space<vmem>>, vector<2x32xf32>
      %c0_12 = arith.constant 0 : index
      %c0_13 = arith.constant 0 : index
      %13 = vector.load %arg5[%c0_12, %c0_13] : memref<1x32xf32, #tpu.memory_space<vmem>>, vector<1x32xf32>
      %14 = vector.broadcast %13 : vector<1x32xf32> to vector<2x32xf32>
      %15 = arith.addf %12, %14 : vector<2x32xf32>
      %c0_14 = arith.constant 0 : index
      %c0_15 = arith.constant 0 : index
      %16 = vector.load %arg6[%c0_14, %c0_15] : memref<2x32xbf16, #tpu.memory_space<vmem>>, vector<2x32xbf16>
      %17 = arith.extf %16 : vector<2x32xbf16> to vector<2x32xf32>
      %18 = arith.addf %15, %17 : vector<2x32xf32>
      %cst_16 = arith.constant dense<0.000000e+00> : vector<2xf32>
      %19 = vector.multi_reduction <add>, %18, %cst_16 [1] : vector<2x32xf32> to vector<2xf32>
      %20 = vector.shape_cast %19 : vector<2xf32> to vector<2x1xf32>
      %cst_17 = arith.constant 3.200000e+01 : f32
      %21 = vector.broadcast %cst_17 : f32 to vector<2x1xf32>
      %22 = arith.divf %20, %21 : vector<2x1xf32>
      %23 = vector.broadcast %22 : vector<2x1xf32> to vector<2x32xf32>
      %24 = arith.subf %18, %23 : vector<2x32xf32>
      %25 = vector.broadcast %22 : vector<2x1xf32> to vector<2x32xf32>
      %26 = arith.subf %18, %25 : vector<2x32xf32>
      %27 = arith.mulf %24, %26 : vector<2x32xf32>
      %cst_18 = arith.constant dense<0.000000e+00> : vector<2xf32>
      %28 = vector.multi_reduction <add>, %27, %cst_18 [1] : vector<2x32xf32> to vector<2xf32>
      %29 = vector.shape_cast %28 : vector<2xf32> to vector<2x1xf32>
      %cst_19 = arith.constant 3.200000e+01 : f32
      %30 = vector.broadcast %cst_19 : f32 to vector<2x1xf32>
      %31 = arith.divf %29, %30 : vector<2x1xf32>
      %32 = vector.broadcast %22 : vector<2x1xf32> to vector<2x32xf32>
      %33 = arith.subf %18, %32 : vector<2x32xf32>
      %cst_20 = arith.constant 9.99999996E-13 : f32
      %34 = vector.broadcast %cst_20 : f32 to vector<2x1xf32>
      %35 = arith.addf %31, %34 : vector<2x1xf32>
      %36 = math.rsqrt %35 : vector<2x1xf32>
      %37 = vector.broadcast %36 : vector<2x1xf32> to vector<2x32xf32>
      %38 = arith.mulf %33, %37 : vector<2x32xf32>
      %c0_21 = arith.constant 0 : index
      %c0_22 = arith.constant 0 : index
      %39 = vector.load %arg7[%c0_21, %c0_22] : memref<1x32xf32, #tpu.memory_space<vmem>>, vector<1x32xf32>
      %40 = vector.broadcast %39 : vector<1x32xf32> to vector<2x32xf32>
      %41 = arith.mulf %38, %40 : vector<2x32xf32>
      %c0_23 = arith.constant 0 : index
      %c0_24 = arith.constant 0 : index
      %42 = vector.load %arg8[%c0_23, %c0_24] : memref<1x32xf32, #tpu.memory_space<vmem>>, vector<1x32xf32>
      %43 = vector.broadcast %42 : vector<1x32xf32> to vector<2x32xf32>
      %44 = arith.addf %41, %43 : vector<2x32xf32>
      %45 = arith.truncf %44 : vector<2x32xf32> to vector<2x32xbf16>
      %c0_25 = arith.constant 0 : index
      %c0_26 = arith.constant 0 : index
      %46 = vector.load %arg9[%c0_25, %c0_26] : memref<2x32xbf16, #tpu.memory_space<vmem>>, vector<2x32xbf16>
      tpu.vector_store %arg9[%c0_25, %c0_26], %45 {strides = array<i32>} : memref<2x32xbf16, #tpu.memory_space<vmem>>, vector<2x32xbf16>,
    } else {
    }
    return
  }
  func.func @transform_0(%arg0: i32, %arg1: i32, %arg2: i32) -> (i32, i32) {
    %c0_i32 = arith.constant 0 : i32
    return %arg0, %arg2 : i32, i32
  }
  func.func @transform_1(%arg0: i32, %arg1: i32, %arg2: i32) -> (i32, i32) {
    %c0_i32 = arith.constant 0 : i32
    return %arg2, %arg1 : i32, i32
  }
  func.func @transform_2(%arg0: i32, %arg1: i32, %arg2: i32) -> (i32, i32) {
    %c0_i32 = arith.constant 0 : i32
    %c0_i32_0 = arith.constant 0 : i32
    return %c0_i32, %arg1 : i32, i32
  }
  func.func @transform_3(%arg0: i32, %arg1: i32, %arg2: i32) -> (i32, i32) {
    %c0_i32 = arith.constant 0 : i32
    return %arg0, %arg1 : i32, i32
  }
  func.func @transform_4(%arg0: i32, %arg1: i32, %arg2: i32) -> (i32, i32) {
    %c0_i32 = arith.constant 0 : i32
    %c0_i32_0 = arith.constant 0 : i32
    return %c0_i32, %arg1 : i32, i32
  }
  func.func @transform_5(%arg0: i32, %arg1: i32, %arg2: i32) -> (i32, i32) {
    %c0_i32 = arith.constant 0 : i32
    %c0_i32_0 = arith.constant 0 : i32
    return %c0_i32, %arg1 : i32, i32
  }
  func.func @transform_6(%arg0: i32, %arg1: i32, %arg2: i32) -> (i32, i32) {
    %c0_i32 = arith.constant 0 : i32
    return %arg0, %arg1 : i32, i32
  }
}

module attributes {stable_mosaic.version = 11 : i64} {
  func.func @_dense_kernel(%arg0: i32, %arg1: i32, %arg2: i32, %arg3: memref<2x32xbf16, #tpu.memory_space<vmem>>, %arg4: memref<32x64xbf16, #tpu.memory_space<vmem>>, %arg5: memref<1x64xf32, #tpu.memory_space<vmem>>, %arg6: memref<2x64xbf16, #tpu.memory_space<vmem>>, %arg7: memref<2x64xf32, #tpu.memory_space<vmem>>) attributes {dimension_semantics = [#tpu.dimension_semantics<parallel>, #tpu.dimension_semantics<parallel>, #tpu.dimension_semantics<arbitrary>], iteration_bounds = array<i64: 1, 1, 1>, scalar_prefetch = 0 : i64, scratch_operands = 1 : i64, tpu.core_type = #tpu.core_type<tc>, window_params = [{transform_indices = @transform_0, window_bounds = array<i64: 2, 32>}, {transform_indices = @transform_1, window_bounds = array<i64: 32, 64>}, {transform_indices = @transform_2, window_bounds = array<i64: 1, 64>}, {transform_indices = @transform_3, window_bounds = array<i64: 2, 64>}]} {
    %c0_i32 = arith.constant 0 : i32
    %0 = arith.cmpi eq, %arg2, %c0_i32 : i32
    %1 = arith.extui %0 : i1 to i32
    %c0_i32_0 = arith.constant 0 : i32
    %2 = arith.cmpi ne, %1, %c0_i32_0 : i32
    scf.if %2 {
      %cst_10 = arith.constant 0.000000e+00 : f32
      %12 = vector.broadcast %cst_10 : f32 to vector<2x64xf32>
      %c0_11 = arith.constant 0 : index
      %c0_12 = arith.constant 0 : index
      %13 = vector.load %arg7[%c0_11, %c0_12] : memref<2x64xf32, #tpu.memory_space<vmem>>, vector<2x64xf32>
      tpu.vector_store %arg7[%c0_11, %c0_12], %12 {strides = array<i32>} : memref<2x64xf32, #tpu.memory_space<vmem>>, vector<2x64xf32>,
    } else {
    }
    %c0 = arith.constant 0 : index
    %c0_1 = arith.constant 0 : index
    %3 = vector.load %arg7[%c0, %c0_1] : memref<2x64xf32, #tpu.memory_space<vmem>>, vector<2x64xf32>
    %c0_2 = arith.constant 0 : index
    %c0_3 = arith.constant 0 : index
    %4 = vector.load %arg3[%c0_2, %c0_3] : memref<2x32xbf16, #tpu.memory_space<vmem>>, vector<2x32xbf16>
    %c0_4 = arith.constant 0 : index
    %c0_5 = arith.constant 0 : index
    %5 = vector.load %arg4[%c0_4, %c0_5] : memref<32x64xbf16, #tpu.memory_space<vmem>>, vector<32x64xbf16>
    %cst = arith.constant dense<0.000000e+00> : vector<2x64xf32>
    %6 = tpu.matmul %4, %5, %cst {dimension_numbers = #tpu.dot_dimension_numbers<[1], [0], [0], [1], [0, 0, 1, 1], [], []>} : vector<2x32xbf16>, vector<32x64xbf16>, vector<2x64xf32> -> vector<2x64xf32>
    %7 = arith.addf %3, %6 : vector<2x64xf32>
    %c0_6 = arith.constant 0 : index
    %c0_7 = arith.constant 0 : index
    %8 = vector.load %arg7[%c0_6, %c0_7] : memref<2x64xf32, #tpu.memory_space<vmem>>, vector<2x64xf32>
    tpu.vector_store %arg7[%c0_6, %c0_7], %7 {strides = array<i32>} : memref<2x64xf32, #tpu.memory_space<vmem>>, vector<2x64xf32>,
    %c0_i32_8 = arith.constant 0 : i32
    %9 = arith.cmpi eq, %arg2, %c0_i32_8 : i32
    %10 = arith.extui %9 : i1 to i32
    %c0_i32_9 = arith.constant 0 : i32
    %11 = arith.cmpi ne, %10, %c0_i32_9 : i32
    scf.if %11 {
      %c0_10 = arith.constant 0 : index
      %c0_11 = arith.constant 0 : index
      %12 = vector.load %arg7[%c0_10, %c0_11] : memref<2x64xf32, #tpu.memory_space<vmem>>, vector<2x64xf32>
      %c0_12 = arith.constant 0 : index
      %c0_13 = arith.constant 0 : index
      %13 = vector.load %arg5[%c0_12, %c0_13] : memref<1x64xf32, #tpu.memory_space<vmem>>, vector<1x64xf32>
      %14 = vector.broadcast %13 : vector<1x64xf32> to vector<2x64xf32>
      %15 = arith.addf %12, %14 : vector<2x64xf32>
      %cst_14 = arith.constant 5.000000e-01 : f32
      %16 = vector.broadcast %cst_14 : f32 to vector<2x64xf32>
      %17 = arith.mulf %16, %15 : vector<2x64xf32>
      %cst_15 = arith.constant 4.471500e-02 : f32
      %18 = vector.broadcast %cst_15 : f32 to vector<2x64xf32>
      %19 = arith.mulf %18, %15 : vector<2x64xf32>
      %20 = arith.mulf %19, %15 : vector<2x64xf32>
      %21 = arith.mulf %20, %15 : vector<2x64xf32>
      %22 = arith.addf %15, %21 : vector<2x64xf32>
      %cst_16 = arith.constant 0.797884583 : f32
      %23 = vector.broadcast %cst_16 : f32 to vector<2x64xf32>
      %24 = arith.mulf %23, %22 : vector<2x64xf32>
      %25 = math.tanh %24 : vector<2x64xf32>
      %cst_17 = arith.constant 1.000000e+00 : f32
      %26 = vector.broadcast %cst_17 : f32 to vector<2x64xf32>
      %27 = arith.addf %26, %25 : vector<2x64xf32>
      %28 = arith.mulf %17, %27 : vector<2x64xf32>
      %29 = arith.truncf %28 : vector<2x64xf32> to vector<2x64xbf16>
      %c0_18 = arith.constant 0 : index
      %c0_19 = arith.constant 0 : index
      %30 = vector.load %arg6[%c0_18, %c0_19] : memref<2x64xbf16, #tpu.memory_space<vmem>>, vector<2x64xbf16>
      tpu.vector_store %arg6[%c0_18, %c0_19], %29 {strides = array<i32>} : memref<2x64xbf16, #tpu.memory_space<vmem>>, vector<2x64xbf16>,
    } else {
    }
    return
  }
  func.func @transform_0(%arg0: i32, %arg1: i32, %arg2: i32) -> (i32, i32) {
    %c0_i32 = arith.constant 0 : i32
    return %arg0, %arg2 : i32, i32
  }
  func.func @transform_1(%arg0: i32, %arg1: i32, %arg2: i32) -> (i32, i32) {
    %c0_i32 = arith.constant 0 : i32
    return %arg2, %arg1 : i32, i32
  }
  func.func @transform_2(%arg0: i32, %arg1: i32, %arg2: i32) -> (i32, i32) {
    %c0_i32 = arith.constant 0 : i32
    %c0_i32_0 = arith.constant 0 : i32
    return %c0_i32, %arg1 : i32, i32
  }
  func.func @transform_3(%arg0: i32, %arg1: i32, %arg2: i32) -> (i32, i32) {
    %c0_i32 = arith.constant 0 : i32
    return %arg0, %arg1 : i32, i32
  }
}

module attributes {stable_mosaic.version = 11 : i64} {
  func.func @_dense_kernel(%arg0: i32, %arg1: i32, %arg2: i32, %arg3: memref<2x64xbf16, #tpu.memory_space<vmem>>, %arg4: memref<64x32xbf16, #tpu.memory_space<vmem>>, %arg5: memref<1x32xf32, #tpu.memory_space<vmem>>, %arg6: memref<2x32xbf16, #tpu.memory_space<vmem>>, %arg7: memref<1x32xf32, #tpu.memory_space<vmem>>, %arg8: memref<1x32xf32, #tpu.memory_space<vmem>>, %arg9: memref<2x32xf32, #tpu.memory_space<vmem>>, %arg10: memref<2x32xf32, #tpu.memory_space<vmem>>) attributes {dimension_semantics = [#tpu.dimension_semantics<parallel>, #tpu.dimension_semantics<parallel>, #tpu.dimension_semantics<arbitrary>], iteration_bounds = array<i64: 1, 1, 1>, scalar_prefetch = 0 : i64, scratch_operands = 1 : i64, tpu.core_type = #tpu.core_type<tc>, window_params = [{transform_indices = @transform_0, window_bounds = array<i64: 2, 64>}, {transform_indices = @transform_1, window_bounds = array<i64: 64, 32>}, {transform_indices = @transform_2, window_bounds = array<i64: 1, 32>}, {transform_indices = @transform_3, window_bounds = array<i64: 2, 32>}, {transform_indices = @transform_4, window_bounds = array<i64: 1, 32>}, {transform_indices = @transform_5, window_bounds = array<i64: 1, 32>}, {transform_indices = @transform_6, window_bounds = array<i64: 2, 32>}]} {
    %c0_i32 = arith.constant 0 : i32
    %0 = arith.cmpi eq, %arg2, %c0_i32 : i32
    %1 = arith.extui %0 : i1 to i32
    %c0_i32_0 = arith.constant 0 : i32
    %2 = arith.cmpi ne, %1, %c0_i32_0 : i32
    scf.if %2 {
      %cst_10 = arith.constant 0.000000e+00 : f32
      %12 = vector.broadcast %cst_10 : f32 to vector<2x32xf32>
      %c0_11 = arith.constant 0 : index
      %c0_12 = arith.constant 0 : index
      %13 = vector.load %arg10[%c0_11, %c0_12] : memref<2x32xf32, #tpu.memory_space<vmem>>, vector<2x32xf32>
      tpu.vector_store %arg10[%c0_11, %c0_12], %12 {strides = array<i32>} : memref<2x32xf32, #tpu.memory_space<vmem>>, vector<2x32xf32>,
    } else {
    }
    %c0 = arith.constant 0 : index
    %c0_1 = arith.constant 0 : index
    %3 = vector.load %arg10[%c0, %c0_1] : memref<2x32xf32, #tpu.memory_space<vmem>>, vector<2x32xf32>
    %c0_2 = arith.constant 0 : index
    %c0_3 = arith.constant 0 : index
    %4 = vector.load %arg3[%c0_2, %c0_3] : memref<2x64xbf16, #tpu.memory_space<vmem>>, vector<2x64xbf16>
    %c0_4 = arith.constant 0 : index
    %c0_5 = arith.constant 0 : index
    %5 = vector.load %arg4[%c0_4, %c0_5] : memref<64x32xbf16, #tpu.memory_space<vmem>>, vector<64x32xbf16>
    %cst = arith.constant dense<0.000000e+00> : vector<2x32xf32>
    %6 = tpu.matmul %4, %5, %cst {dimension_numbers = #tpu.dot_dimension_numbers<[1], [0], [0], [1], [0, 0, 1, 1], [], []>} : vector<2x64xbf16>, vector<64x32xbf16>, vector<2x32xf32> -> vector<2x32xf32>
    %7 = arith.addf %3, %6 : vector<2x32xf32>
    %c0_6 = arith.constant 0 : index
    %c0_7 = arith.constant 0 : index
    %8 = vector.load %arg10[%c0_6, %c0_7] : memref<2x32xf32, #tpu.memory_space<vmem>>, vector<2x32xf32>
    tpu.vector_store %arg10[%c0_6, %c0_7], %7 {strides = array<i32>} : memref<2x32xf32, #tpu.memory_space<vmem>>, vector<2x32xf32>,
    %c0_i32_8 = arith.constant 0 : i32
    %9 = arith.cmpi eq, %arg2, %c0_i32_8 : i32
    %10 = arith.extui %9 : i1 to i32
    %c0_i32_9 = arith.constant 0 : i32
    %11 = arith.cmpi ne, %10, %c0_i32_9 : i32
    scf.if %11 {
      %c0_10 = arith.constant 0 : index
      %c0_11 = arith.constant 0 : index
      %12 = vector.load %arg10[%c0_10, %c0_11] : memref<2x32xf32, #tpu.memory_space<vmem>>, vector<2x32xf32>
      %c0_12 = arith.constant 0 : index
      %c0_13 = arith.constant 0 : index
      %13 = vector.load %arg5[%c0_12, %c0_13] : memref<1x32xf32, #tpu.memory_space<vmem>>, vector<1x32xf32>
      %14 = vector.broadcast %13 : vector<1x32xf32> to vector<2x32xf32>
      %15 = arith.addf %12, %14 : vector<2x32xf32>
      %c0_14 = arith.constant 0 : index
      %c0_15 = arith.constant 0 : index
      %16 = vector.load %arg6[%c0_14, %c0_15] : memref<2x32xbf16, #tpu.memory_space<vmem>>, vector<2x32xbf16>
      %17 = arith.extf %16 : vector<2x32xbf16> to vector<2x32xf32>
      %18 = arith.addf %15, %17 : vector<2x32xf32>
      %cst_16 = arith.constant dense<0.000000e+00> : vector<2xf32>
      %19 = vector.multi_reduction <add>, %18, %cst_16 [1] : vector<2x32xf32> to vector<2xf32>
      %20 = vector.shape_cast %19 : vector<2xf32> to vector<2x1xf32>
      %cst_17 = arith.constant 3.200000e+01 : f32
      %21 = vector.broadcast %cst_17 : f32 to vector<2x1xf32>
      %22 = arith.divf %20, %21 : vector<2x1xf32>
      %23 = vector.broadcast %22 : vector<2x1xf32> to vector<2x32xf32>
      %24 = arith.subf %18, %23 : vector<2x32xf32>
      %25 = vector.broadcast %22 : vector<2x1xf32> to vector<2x32xf32>
      %26 = arith.subf %18, %25 : vector<2x32xf32>
      %27 = arith.mulf %24, %26 : vector<2x32xf32>
      %cst_18 = arith.constant dense<0.000000e+00> : vector<2xf32>
      %28 = vector.multi_reduction <add>, %27, %cst_18 [1] : vector<2x32xf32> to vector<2xf32>
      %29 = vector.shape_cast %28 : vector<2xf32> to vector<2x1xf32>
      %cst_19 = arith.constant 3.200000e+01 : f32
      %30 = vector.broadcast %cst_19 : f32 to vector<2x1xf32>
      %31 = arith.divf %29, %30 : vector<2x1xf32>
      %32 = vector.broadcast %22 : vector<2x1xf32> to vector<2x32xf32>
      %33 = arith.subf %18, %32 : vector<2x32xf32>
      %cst_20 = arith.constant 9.99999996E-13 : f32
      %34 = vector.broadcast %cst_20 : f32 to vector<2x1xf32>
      %35 = arith.addf %31, %34 : vector<2x1xf32>
      %36 = math.rsqrt %35 : vector<2x1xf32>
      %37 = vector.broadcast %36 : vector<2x1xf32> to vector<2x32xf32>
      %38 = arith.mulf %33, %37 : vector<2x32xf32>
      %c0_21 = arith.constant 0 : index
      %c0_22 = arith.constant 0 : index
      %39 = vector.load %arg7[%c0_21, %c0_22] : memref<1x32xf32, #tpu.memory_space<vmem>>, vector<1x32xf32>
      %40 = vector.broadcast %39 : vector<1x32xf32> to vector<2x32xf32>
      %41 = arith.mulf %38, %40 : vector<2x32xf32>
      %c0_23 = arith.constant 0 : index
      %c0_24 = arith.constant 0 : index
      %42 = vector.load %arg8[%c0_23, %c0_24] : memref<1x32xf32, #tpu.memory_space<vmem>>, vector<1x32xf32>
      %43 = vector.broadcast %42 : vector<1x32xf32> to vector<2x32xf32>
      %44 = arith.addf %41, %43 : vector<2x32xf32>
      %45 = arith.mulf %44, %44 : vector<2x32xf32>
      %cst_25 = arith.constant dense<0.000000e+00> : vector<2xf32>
      %46 = vector.multi_reduction <add>, %45, %cst_25 [1] : vector<2x32xf32> to vector<2xf32>
      %47 = vector.shape_cast %46 : vector<2xf32> to vector<2x1xf32>
      %cst_26 = arith.constant 1.000000e-24 : f32
      %48 = vector.broadcast %cst_26 : f32 to vector<2x1xf32>
      %49 = arith.maximumf %47, %48 : vector<2x1xf32>
      %50 = math.rsqrt %49 : vector<2x1xf32>
      %51 = vector.broadcast %50 : vector<2x1xf32> to vector<2x32xf32>
      %52 = arith.mulf %44, %51 : vector<2x32xf32>
      %c0_27 = arith.constant 0 : index
      %c0_28 = arith.constant 0 : index
      %53 = vector.load %arg9[%c0_27, %c0_28] : memref<2x32xf32, #tpu.memory_space<vmem>>, vector<2x32xf32>
      tpu.vector_store %arg9[%c0_27, %c0_28], %52 {strides = array<i32>} : memref<2x32xf32, #tpu.memory_space<vmem>>, vector<2x32xf32>,
    } else {
    }
    return
  }
  func.func @transform_0(%arg0: i32, %arg1: i32, %arg2: i32) -> (i32, i32) {
    %c0_i32 = arith.constant 0 : i32
    return %arg0, %arg2 : i32, i32
  }
  func.func @transform_1(%arg0: i32, %arg1: i32, %arg2: i32) -> (i32, i32) {
    %c0_i32 = arith.constant 0 : i32
    return %arg2, %arg1 : i32, i32
  }
  func.func @transform_2(%arg0: i32, %arg1: i32, %arg2: i32) -> (i32, i32) {
    %c0_i32 = arith.constant 0 : i32
    %c0_i32_0 = arith.constant 0 : i32
    return %c0_i32, %arg1 : i32, i32
  }
  func.func @transform_3(%arg0: i32, %arg1: i32, %arg2: i32) -> (i32, i32) {
    %c0_i32 = arith.constant 0 : i32
    return %arg0, %arg1 : i32, i32
  }
  func.func @transform_4(%arg0: i32, %arg1: i32, %arg2: i32) -> (i32, i32) {
    %c0_i32 = arith.constant 0 : i32
    %c0_i32_0 = arith.constant 0 : i32
    return %c0_i32, %arg1 : i32, i32
  }
  func.func @transform_5(%arg0: i32, %arg1: i32, %arg2: i32) -> (i32, i32) {
    %c0_i32 = arith.constant 0 : i32
    %c0_i32_0 = arith.constant 0 : i32
    return %c0_i32, %arg1 : i32, i32
  }
  func.func @transform_6(%arg0: i32, %arg1: i32, %arg2: i32) -> (i32, i32) {
    %c0_i32 = arith.constant 0 : i32
    return %arg0, %arg1 : i32, i32
  }
}

</mosaic_0001>

<bundles_post_ra>
// kernel: gloss_encoder_forward.11
= control target key start
LH: loop header
LB: loop body
LE: loop exit
PB: predicated region body
PF: predicated region fallthrough
CT: control target
= control target key end

     0   :  { %vm16_vm0 = vcmask 261120   ;;  %vm70_vm1 = vcmask 257024   ;;  %s129_s0 = inlined_call_operand.vmem [shape: f32[16,32], index: 0, kind: input, shape index: {}]   ;;  %s130_s1 = inlined_call_operand.vmem [shape: f32[1,32], index: 1, kind: input, shape index: {}]   ;;  %s131_s2 = inlined_call_operand.vmem [shape: f32[1,32], index: 2, kind: input, shape index: {}]   ;;  %s132_s3 = inlined_call_operand.vmem [shape: bf16[16,32], index: 3, kind: output, shape index: {}]  }
   0x1   :  { %v14_v0 = vld [vmem:[%s129_s0] sm:$0xff]  ;;  %v15_v1 = vld [vmem:[%s129_s0 + $0x8] sm:$0xff] }
   0x2   :  { %v17_v2 = vsel %vm16_vm0, %v14_v0, 0.0  ;;  %v20_v3 = vsel %vm16_vm0, %v15_v1, 0.0  ;;  %v77_v21 = vld [vmem:[%s130_s1] ss:$0 sm:$0xff] }
   0x3   :  { %18 = vadd.xlane.f32.xlu0 %v17_v2  ;;  %v78_v23 = vld [vmem:[%s131_s2] ss:$0 sm:$0xff] }
   0x7   :  { %21 = vadd.xlane.f32.xlu0 %v20_v3 }
  0x90   :  { %v19_v4 = vpop.xlane.xlu0 %18 }
  0x91   :  { %v24_v5 = vmul.f32 0.03125, %v19_v4 }
  0x93   :  { %v26_v6 = vsub.f32 %v14_v0, %v24_v5 }
  0x94   :  { %v22_v7 = vpop.xlane.xlu0 %21 }
  0x95   :  { %v25_v8 = vmul.f32 0.03125, %v22_v7  ;;  %v28_v9 = vmul.f32 %v26_v6, %v26_v6 }
  0x97   :  { %v27_v10 = vsub.f32 %v15_v1, %v25_v8  ;;  %v30_v11 = vsel %vm16_vm0, %v28_v9, 0.0 }
  0x98   :  { %31 = vadd.xlane.f32.xlu1 %v30_v11 }
  0x99   :  { %v29_v12 = vmul.f32 %v27_v10, %v27_v10 }
  0x9b   :  { %v33_v13 = vsel %vm16_vm0, %v29_v12, 0.0 }
  0x9c   :  { %34 = vadd.xlane.f32.xlu1 %v33_v13 }
 0x125   :  { %v32_v14 = vpop.xlane.xlu1 %31 }
 0x126   :  { %v36_v15 = vmul.f32 0.03125, %v32_v14 }
 0x128   :  { %v38_v16 = vadd.f32 1e-12, %v36_v15 }
 0x129   :  { %v35_v17 = vpop.xlane.xlu1 %34 }
 0x12a   :  { %83 = vrsqrt.f32 %v38_v16  ;;  %v37_v18 = vmul.f32 0.03125, %v35_v17 }
 0x12c   :  { %v39_v19 = vadd.f32 1e-12, %v37_v18 }
 0x12e   :  { %85 = vrsqrt.f32 %v39_v19 }
 0x134   :  { %v84_v20 = vpop.eup %83 }
 0x135   :  { %v42_v22 = vmul.f32 %v84_v20, %v26_v6 }
 0x137   :  { %v51_v24 = vmul.f32 %v77_v21, %v42_v22 }
 0x138   :  { %v86_v25 = vpop.eup %85 }
 0x139   :  { %v60_v26 = vadd.f32 %v78_v23, %v51_v24  ;;  %v43_v27 = vmul.f32 %v86_v25, %v27_v10 }
 0x13b   :  { %v81_v28 = vpack.c.bf16 %v60_v26, %v60_v26  ;;  %v52_v29 = vmul.f32 %v77_v21, %v43_v27 }
 0x13d   :  { %71 = vst.msk [vmem:[%s132_s3] sm:$0xf] %vm70_vm1, %v81_v28  ;;  %v61_v30 = vadd.f32 %v78_v23, %v52_v29 }
 0x13f   :  { %v82_v31 = vpack.c.bf16 %v61_v30, %v61_v30 }
 0x141   :  { %72 = vst.msk [vmem:[%s132_s3 + $0x4] sm:$0xf] %vm70_vm1, %v82_v31 }

// kernel: gloss_encoder_forward.12
= control target key start
LH: loop header
LB: loop body
LE: loop exit
PB: predicated region body
PF: predicated region fallthrough
CT: control target
= control target key end

     0   :  { %vm19_vm0 = vcmask 785408   ;;  %v151_v0 = vmov 0.0   ;;  %vm152_vm1 = vmmov 0   ;;  %vm47_vm2 = vcmask 261120   ;;  %s195_s1 = inlined_call_operand.vmem [shape: bf16[32,96], index: 1, kind: input, shape index: {}]   ;;  %s196_s0 = inlined_call_operand.vmem [shape: bf16[16,32], index: 0, kind: input, shape index: {}]   ;;  %s197_s2 = inlined_call_operand.vmem [shape: f32[1,96], index: 2, kind: input, shape index: {}]   ;;  %s198_s3 = inlined_call_operand.vmem [shape: bf16[16,96], index: 3, kind: output, shape index: {}]  }
   0x1   :  { %138 = vmatprep.subr.bf16.mxu0 %v151_v0  ;;  %v148_v1 = vld [vmem:[%s195_s1] sm:$0xff]   ;;  %142 = vmatprep.mubr.msk.bf16.mxu0 %vm152_vm1, %v151_v0  ;;  %20 = vst.msk [vmem:[#allocation2] sm:$0xff] %vm19_vm0, %v151_v0  ;;  %21 = vst.msk [vmem:[#allocation2 + $0x8] sm:$0xff] %vm19_vm0, %v151_v0  ;;  %v149_v2 = vld [vmem:[%s195_s1 + $0x8] sm:$0xff]   ;;  %vm119_vm3 = vcmask 781312  }
   0x2   :  { %139 = vmatpush3.bf16.msra.mxu0 %v148_v1  ;;  %v150_v3 = vld [vmem:[%s196_s0] sm:$0xff]  }
   0x3   :  { %140 = vmatprep.subr.bf16.mxu0 %v151_v0  ;;  %v130_v12 = vld [vmem:[%s197_s2] ss:$0 sm:$0xff] }
   0x6   :  { %141 = vmatpush3.bf16.msra.mxu0 %v149_v2 }
   0x8   :  { %v22_v4 = vld [vmem:[#allocation2] sm:$0xff]  ;;  %v23_v6 = vld [vmem:[#allocation2 + $0x8] sm:$0xff] }
   0x9   :  { %143 = vmatmul.mubr.msk.bf16.vlgmr.msra.gmra.mrb[0].mxu0 %vm47_vm2, %v150_v3 }
  0xdc   :  { %v85_v5 = vpop.f32.mrb[0].mxu0 }
  0xdd   :  { %v92_v7 = vadd.f32 %v85_v5, %v22_v4  ;;  %v144_v8 = vpop.f32.mrb[1].mxu0 }
  0xde   :  { %v88_v9 = vpop.f32.mrb[2].mxu0 }
  0xdf   :  { %95 = vst.msk [vmem:[#allocation2] sm:$0xff] %vm19_vm0, %v92_v7  ;;  %v93_v10 = vadd.f32 %v88_v9, %v23_v6  ;;  %v145_v11 = vpop.f32.mrb[3].mxu0 }
  0xe1   :  { %96 = vst.msk [vmem:[#allocation2 + $0x8] sm:$0xff] %vm19_vm0, %v93_v10 }
  0xe6   :  { %v100_v13 = vld [vmem:[#allocation2] sm:$0xff] }
  0xe7   :  { %v109_v14 = vadd.f32 %v130_v12, %v100_v13 }
  0xe8   :  { %v101_v15 = vld [vmem:[#allocation2 + $0x8] sm:$0xff] }
  0xe9   :  { %v133_v16 = vpack.c.bf16 %v109_v14, %v109_v14  ;;  %v110_v17 = vadd.f32 %v130_v12, %v101_v15 }
  0xeb   :  { %120 = vst.msk [vmem:[%s198_s3] sm:$0xf] %vm119_vm3, %v133_v16  ;;  %v134_v18 = vpack.c.bf16 %v110_v17, %v110_v17 }
  0xed   :  { %121 = vst.msk [vmem:[%s198_s3 + $0x4] sm:$0xf] %vm119_vm3, %v134_v18 }

// kernel: gloss_encoder_forward.13
= control target key start
LH: loop header
LB: loop body
LE: loop exit
PB: predicated region body
PF: predicated region fallthrough
CT: control target
= control target key end

     0   :  { %s705_s15 = smov 0   ;;  %s707_s16 = smov 0   ;;  %s776_s0 = inlined_call_operand.vmem [shape: bf16[2,4,8,8], index: 0, kind: input, shape index: {}]   ;;  %s777_s1 = inlined_call_operand.vmem [shape: bf16[2,4,8,8], index: 1, kind: input, shape index: {}]   ;;  %s778_s2 = inlined_call_operand.vmem [shape: bf16[2,4,8,8], index: 2, kind: input, shape index: {}]   ;;  %s779_s3 = inlined_call_operand.vmem [shape: f32[2,1,8], index: 3, kind: input, shape index: {}]   ;;  %s780_s4 = inlined_call_operand.vmem [shape: bf16[2,4,8,8], index: 4, kind: output, shape index: {}]  }
   0x1   :  { %s709_s17 = smov 0   ;;  %s711_s18 = smov 0  }
   0x2   :  { %s713_s19 = smov 0  }
   0x3 LB: > { %s23_s20 = sadd.s32 1, %s668_s17  ;;  %s26_s21 = sadd.s32 1, %s672_s18  ;;  %s676_s19 = sphi %s713_s19, %s14_s19   ;;  %s672_s18 = sphi %s711_s18, %s784_s18   ;;  %s668_s17 = sphi %s709_s17, %s783_s17   ;;  %s664_s16 = sphi %s707_s16, %s782_s16   ;;  %s660_s15 = sphi %s705_s15, %s781_s15  }
   0x4   : > { %p24_p0 = scmp.ge.s32.totalorder %s23_s20, 4  ;;  %p562_p1 = scmp.ge.s32.totalorder %s676_s19, 1 }
   0x5   : > { %p219_p2 = scmp.lt.s32.totalorder %s676_s19, 9 }
   0x6   : > { %s786_s20 = smov (%p24_p0, %s23_s20), 0  ;;  %s788_s21 = smov (!%p24_p0, %s26_s21), %s672_s18 }
   0x7   : > { %p220_p3 = pnand %p562_p1, %p219_p2  ;;  %p28_p4 = scmp.ge.s32.totalorder %s788_s21, 2 }
   0x8   : > { %p270_p5 = scmp.lt.s32.totalorder (!%p220_p3), %s664_s16, 1  ;;  %p272_p6 = scmp.lt.s32.totalorder (!%p220_p3), %s660_s15, 3  ;;  %v678_v0 = vmov (!%p220_p3), 0.0   ;;  %vm679_vm0 = vmmov (!%p220_p3), 0   ;;  %vm310_vm1 = vcmask (!%p220_p3), 64512   ;;  %vm380_vm2 = vcmask (!%p220_p3), 1043456  }
   0x9   : > { %s790_s21 = smov (%p28_p4, %s788_s21), 0  ;;  %223 = sbr.rel (%p220_p3) target bundleno = 777 (0x309), region = 36 }
   0xa   : > { %580 = vmatprep.subr.bf16.mxu0 (!%p220_p3), %v678_v0  ;;  %582 = vmatprep.mubr.msk.bf16.mxu0 (!%p220_p3), %vm679_vm0, %v678_v0  ;;  %vm425_vm3 = vcmask (!%p220_p3), 60416  }
   0xb   : > { %586 = vmatprep.subr.bf16.mxu1 (!%p220_p3), %v678_v0  ;;  %588 = vmatprep.mubr.msk.bf16.mxu1 (!%p220_p3), %vm679_vm0, %v678_v0 }
  0x10   : > { %s792_s16 = smov (!%p270_p5, %s664_s16), 1  ;;  %s794_s15 = smov (!%p272_p6, %s660_s15), 3 }
  0x11   : > { %s563_s22 = sshll.u32 %s792_s16, 2  ;;  %s296_s7 = scalar_lea.vmem %s779_s3, %s792_s16 }
  0x12   : > { %s275_s23 = sadd.s32 %s563_s22, %s794_s15  ;;  %v572_v5 = vld [vmem:[%s296_s7] ss:$0 sm:$0xff] }
  0x13   : > { %s735_s24 = sshll.u32 %s275_s23, 2 }
  0x14   : > { %s285_s27 = scalar_lea.vmem %s777_s1, %s735_s24  ;;  %s277_s30 = scalar_lea.vmem %s776_s0, %s735_s24 }
  0x15   : > { %v307_v1 = vld [vmem:[%s285_s27] sm:$0xf]  ;;  %s293_s10 = scalar_lea.vmem %s778_s2, %s735_s24  ;;  %s304_s13 = scalar_lea.vmem %s780_s4, %s735_s24 }
  0x16   : > { %v315_v2 = vsel %vm310_vm1, %v307_v1, 0  ;;  %v306_v3 = vld [vmem:[%s277_s30] sm:$0xf] }
  0x17   : > { %581 = vmatpush3.bf16.xpose.msra.mxu0 %v315_v2  ;;  %v308_v17 = vld [vmem:[%s293_s10] sm:$0xf] }
  0x18   : > { %v382_v18 = vsel %vm380_vm2, %v308_v17, 0 }
  0x19   : > { %587 = vmatpush3.bf16.msra.mxu1 %v382_v18 }
  0x1e   : > { %583 = vmatmul.mubr.msk.bf16.vlgmr.msra.gmra.mrb[0].mxu0 %vm310_vm1, %v306_v3 }
  0xf1   : > { %v351_v4 = vpop.f32.mrb[0].mxu0 }
  0xf2   : > { %v357_v6 = vmul.f32 0.35355338, %v351_v4  ;;  %v584_v7 = vpop.f32.mrb[1].mxu0 }
  0xf3   : > { %v354_v8 = vpop.f32.mrb[2].mxu0 }
  0xf4   : > { %v585_v9 = vpop.f32.mrb[3].mxu0  ;;  %v364_v10 = vadd.f32 %v572_v5, %v357_v6 }
  0xf6   : > { %v365_v11 = vsel %vm310_vm1, %v364_v10, -inf }
  0xf7   : > { %366 = vmax.xlane.f32.xlu0 %v365_v11 }
 0x184   : > { %v367_v12 = vpop.xlane.xlu0 %366 }
 0x185   : > { %v368_v13 = vsub.f32 %v364_v10, %v367_v12 }
 0x187   : > { %v369_v14 = vmul.f32 1.442695, %v368_v13 }
 0x189   : > { %634 = vpow2.f32 %v369_v14 }
 0x193   : > { %v635_v15 = vpop.eup %634 }
 0x194   : > { %v371_v16 = vsel %vm310_vm1, %v635_v15, 0.0 }
 0x195   : > { %372 = vadd.xlane.f32.xlu0 %v371_v16 }
 0x222   : > { %v373_v19 = vpop.xlane.xlu0 %372 }
 0x223   : > { %636 = vrcp.f32 %v373_v19 }
 0x22d   : > { %v637_v20 = vpop.eup %636 }
 0x22e   : > { %v375_v21 = vmul.f32 %v637_v20, %v635_v15 }
 0x230   : > { %v376_v22 = vpack.c.bf16 %v375_v21, %v375_v21 }
 0x232   : > { %589 = vmatmul.mubr.msk.bf16.vlgmr.msra.gmra.mrb[0].mxu1 %vm310_vm1, %v376_v22 }
 0x305   : > { %v418_v23 = vpop.f32.mrb[0].mxu1 }
 0x306   : > { %v424_v24 = vpack.c.bf16 %v418_v23, %v418_v23  ;;  %v590_v25 = vpop.f32.mrb[1].mxu1 }
 0x307   : > { %v421_v26 = vpop.f32.mrb[2].mxu1 }
 0x308   : > { %426 = vst.msk [vmem:[%s304_s13] sm:$0xf] %vm425_vm3, %v424_v24  ;;  %v591_v27 = vpop.f32.mrb[3].mxu1 }
 0x309 PF: > { %s14_s19 = sadd.s32 1, %s676_s19   ;;  %s781_s15 = smov %s668_s17 }
 0x30a   : > { %p11_p7 = scmp.ge.s32.totalorder %s14_s19, 10   ;;  %s782_s16 = smov %s672_s18 }
 0x30b   : > { %s783_s17 = smov %s786_s20  ;;  %s784_s18 = smov %s790_s21 }
 0x30c   :  { %13 = sbr.rel (!%p11_p7) target bundleno = 3 (0x3), region = 75 }

// kernel: gloss_encoder_forward.14
= control target key start
LH: loop header
LB: loop body
LE: loop exit
PB: predicated region body
PF: predicated region fallthrough
CT: control target
= control target key end

     0   :  { %vm28_vm0 = vcmask 261120   ;;  %v220_v0 = vmov 0.0   ;;  %vm221_vm1 = vmmov 0   ;;  %vm178_vm2 = vcmask 257024   ;;  %s293_s1 = inlined_call_operand.vmem [shape: bf16[32,32], index: 1, kind: input, shape index: {}]   ;;  %s294_s0 = inlined_call_operand.vmem [shape: bf16[16,32], index: 0, kind: input, shape index: {}]   ;;  %s295_s3 = inlined_call_operand.vmem [shape: bf16[16,32], index: 3, kind: input, shape index: {}]   ;;  %s296_s2 = inlined_call_operand.vmem [shape: f32[1,32], index: 2, kind: input, shape index: {}]   ;;  %s297_s4 = inlined_call_operand.vmem [shape: f32[1,32], index: 4, kind: input, shape index: {}]   ;;  %s298_s5 = inlined_call_operand.vmem [shape: f32[1,32], index: 5, kind: input, shape index: {}]   ;;  %s299_s6 = inlined_call_operand.vmem [shape: bf16[16,32], index: 6, kind: output, shape index: {}]  }
   0x1   :  { %203 = vmatprep.subr.bf16.mxu0 %v220_v0  ;;  %v213_v1 = vld [vmem:[%s293_s1] sm:$0xff]   ;;  %207 = vmatprep.mubr.msk.bf16.mxu0 %vm221_vm1, %v220_v0  ;;  %29 = vst.msk [vmem:[#allocation2] sm:$0xff] %vm28_vm0, %v220_v0  ;;  %30 = vst.msk [vmem:[#allocation2 + $0x8] sm:$0xff] %vm28_vm0, %v220_v0  ;;  %v214_v2 = vld [vmem:[%s293_s1 + $0x8] sm:$0xff]  }
   0x2   :  { %204 = vmatpush3.bf16.msra.mxu0 %v213_v1  ;;  %v215_v3 = vld [vmem:[%s294_s0] sm:$0xff]  }
   0x3   :  { %205 = vmatprep.subr.bf16.mxu0 %v220_v0  ;;  %v197_v12 = vld [vmem:[%s295_s3] sm:$0xff]  }
   0x4   :  { %v189_v13 = vld [vmem:[%s296_s2] ss:$0 sm:$0xff]  ;;  %v198_v14 = vunpack.c.l.bf16 %v197_v12  ;;  %v199_v17 = vunpack.c.h.bf16 %v197_v12 }
   0x5   :  { %v190_v41 = vld [vmem:[%s297_s4] ss:$0 sm:$0xff] }
   0x6   :  { %206 = vmatpush3.bf16.msra.mxu0 %v214_v2  ;;  %v191_v43 = vld [vmem:[%s298_s5] ss:$0 sm:$0xff] }
   0x8   :  { %v31_v4 = vld [vmem:[#allocation2] sm:$0xff]  ;;  %v32_v6 = vld [vmem:[#allocation2 + $0x8] sm:$0xff] }
   0x9   :  { %208 = vmatmul.mubr.msk.bf16.vlgmr.msra.gmra.mrb[0].mxu0 %vm28_vm0, %v215_v3 }
  0xdc   :  { %v94_v5 = vpop.f32.mrb[0].mxu0 }
  0xdd   :  { %v101_v7 = vadd.f32 %v94_v5, %v31_v4  ;;  %v209_v8 = vpop.f32.mrb[1].mxu0 }
  0xde   :  { %v97_v9 = vpop.f32.mrb[2].mxu0 }
  0xdf   :  { %103 = vst.msk [vmem:[#allocation2] sm:$0xff] %vm28_vm0, %v101_v7  ;;  %v102_v10 = vadd.f32 %v97_v9, %v32_v6  ;;  %v210_v11 = vpop.f32.mrb[3].mxu0 }
  0xe1   :  { %104 = vst.msk [vmem:[#allocation2 + $0x8] sm:$0xff] %vm28_vm0, %v102_v10 }
  0xe6   :  { %v108_v15 = vld [vmem:[#allocation2] sm:$0xff] }
  0xe7   :  { %v117_v16 = vadd.f32 %v189_v13, %v108_v15 }
  0xe8   :  { %v109_v18 = vld [vmem:[#allocation2 + $0x8] sm:$0xff] }
  0xe9   :  { %v123_v19 = vadd.f32 %v198_v14, %v117_v16  ;;  %v118_v20 = vadd.f32 %v189_v13, %v109_v18 }
  0xeb   :  { %v125_v21 = vsel %vm28_vm0, %v123_v19, 0.0  ;;  %v124_v22 = vadd.f32 %v199_v17, %v118_v20 }
  0xec   :  { %126 = vadd.xlane.f32.xlu0 %v125_v21 }
  0xed   :  { %v128_v23 = vsel %vm28_vm0, %v124_v22, 0.0 }
  0xf0   :  { %129 = vadd.xlane.f32.xlu0 %v128_v23 }
 0x179   :  { %v127_v24 = vpop.xlane.xlu0 %126 }
 0x17a   :  { %v132_v25 = vmul.f32 0.03125, %v127_v24 }
 0x17c   :  { %v134_v26 = vsub.f32 %v123_v19, %v132_v25 }
 0x17d   :  { %v130_v27 = vpop.xlane.xlu0 %129 }
 0x17e   :  { %v133_v28 = vmul.f32 0.03125, %v130_v27  ;;  %v136_v29 = vmul.f32 %v134_v26, %v134_v26 }
 0x180   :  { %v135_v30 = vsub.f32 %v124_v22, %v133_v28  ;;  %v138_v31 = vsel %vm28_vm0, %v136_v29, 0.0 }
 0x181   :  { %139 = vadd.xlane.f32.xlu1 %v138_v31 }
 0x182   :  { %v137_v32 = vmul.f32 %v135_v30, %v135_v30 }
 0x184   :  { %v141_v33 = vsel %vm28_vm0, %v137_v32, 0.0 }
 0x185   :  { %142 = vadd.xlane.f32.xlu1 %v141_v33 }
 0x20e   :  { %v140_v34 = vpop.xlane.xlu1 %139 }
 0x20f   :  { %v144_v35 = vmul.f32 0.03125, %v140_v34 }
 0x211   :  { %v146_v36 = vadd.f32 1e-12, %v144_v35 }
 0x212   :  { %v143_v37 = vpop.xlane.xlu1 %142 }
 0x213   :  { %216 = vrsqrt.f32 %v146_v36  ;;  %v145_v38 = vmul.f32 0.03125, %v143_v37 }
 0x215   :  { %v147_v39 = vadd.f32 1e-12, %v145_v38 }
 0x217   :  { %218 = vrsqrt.f32 %v147_v39 }
 0x21d   :  { %v217_v40 = vpop.eup %216 }
 0x21e   :  { %v150_v42 = vmul.f32 %v217_v40, %v134_v26 }
 0x220   :  { %v159_v44 = vmul.f32 %v190_v41, %v150_v42 }
 0x221   :  { %v219_v45 = vpop.eup %218 }
 0x222   :  { %v168_v46 = vadd.f32 %v191_v43, %v159_v44  ;;  %v151_v47 = vmul.f32 %v219_v45, %v135_v30 }
 0x224   :  { %v194_v48 = vpack.c.bf16 %v168_v46, %v168_v46  ;;  %v160_v49 = vmul.f32 %v190_v41, %v151_v47 }
 0x226   :  { %179 = vst.msk [vmem:[%s299_s6] sm:$0xf] %vm178_vm2, %v194_v48  ;;  %v169_v50 = vadd.f32 %v191_v43, %v160_v49 }
 0x228   :  { %v195_v51 = vpack.c.bf16 %v169_v50, %v169_v50 }
 0x22a   :  { %180 = vst.msk [vmem:[%s299_s6 + $0x4] sm:$0xf] %vm178_vm2, %v195_v51 }

// kernel: gloss_encoder_forward.15
= control target key start
LH: loop header
LB: loop body
LE: loop exit
PB: predicated region body
PF: predicated region fallthrough
CT: control target
= control target key end

     0   :  { %vm19_vm0 = vcmask 523264   ;;  %v173_v0 = vmov 0.0   ;;  %vm174_vm1 = vmmov 0   ;;  %vm47_vm2 = vcmask 261120   ;;  %s217_s1 = inlined_call_operand.vmem [shape: bf16[32,64], index: 1, kind: input, shape index: {}]   ;;  %s218_s0 = inlined_call_operand.vmem [shape: bf16[16,32], index: 0, kind: input, shape index: {}]   ;;  %s219_s2 = inlined_call_operand.vmem [shape: f32[1,64], index: 2, kind: input, shape index: {}]   ;;  %s220_s3 = inlined_call_operand.vmem [shape: bf16[16,64], index: 3, kind: output, shape index: {}]  }
   0x1   :  { %156 = vmatprep.subr.bf16.mxu0 %v173_v0  ;;  %v166_v1 = vld [vmem:[%s217_s1] sm:$0xff]   ;;  %160 = vmatprep.mubr.msk.bf16.mxu0 %vm174_vm1, %v173_v0  ;;  %20 = vst.msk [vmem:[#allocation2] sm:$0xff] %vm19_vm0, %v173_v0  ;;  %21 = vst.msk [vmem:[#allocation2 + $0x8] sm:$0xff] %vm19_vm0, %v173_v0  ;;  %v167_v2 = vld [vmem:[%s217_s1 + $0x8] sm:$0xff]   ;;  %vm137_vm3 = vcmask 519168  }
   0x2   :  { %157 = vmatpush3.bf16.msra.mxu0 %v166_v1  ;;  %v168_v3 = vld [vmem:[%s218_s0] sm:$0xff]  }
   0x3   :  { %158 = vmatprep.subr.bf16.mxu0 %v173_v0  ;;  %v148_v12 = vld [vmem:[%s219_s2] ss:$0 sm:$0xff] }
   0x6   :  { %159 = vmatpush3.bf16.msra.mxu0 %v167_v2 }
   0x8   :  { %v22_v4 = vld [vmem:[#allocation2] sm:$0xff]  ;;  %v23_v6 = vld [vmem:[#allocation2 + $0x8] sm:$0xff] }
   0x9   :  { %161 = vmatmul.mubr.msk.bf16.vlgmr.msra.gmra.mrb[0].mxu0 %vm47_vm2, %v168_v3 }
  0xdc   :  { %v85_v5 = vpop.f32.mrb[0].mxu0 }
  0xdd   :  { %v92_v7 = vadd.f32 %v85_v5, %v22_v4  ;;  %v162_v8 = vpop.f32.mrb[1].mxu0 }
  0xde   :  { %v88_v9 = vpop.f32.mrb[2].mxu0 }
  0xdf   :  { %95 = vst.msk [vmem:[#allocation2] sm:$0xff] %vm19_vm0, %v92_v7  ;;  %v93_v10 = vadd.f32 %v88_v9, %v23_v6  ;;  %v163_v11 = vpop.f32.mrb[3].mxu0 }
  0xe1   :  { %96 = vst.msk [vmem:[#allocation2 + $0x8] sm:$0xff] %vm19_vm0, %v93_v10 }
  0xe6   :  { %v100_v13 = vld [vmem:[#allocation2] sm:$0xff] }
  0xe7   :  { %v109_v14 = vadd.f32 %v148_v12, %v100_v13 }
  0xe8   :  { %v101_v15 = vld [vmem:[#allocation2 + $0x8] sm:$0xff] }
  0xe9   :  { %v113_v16 = vmul.f32 0.044715, %v109_v14  ;;  %v110_v17 = vadd.f32 %v148_v12, %v101_v15  ;;  %v111_v28 = vmul.f32 0.5, %v109_v14 }
  0xeb   :  { %v115_v18 = vmul.f32 %v113_v16, %v109_v14  ;;  %v114_v19 = vmul.f32 0.044715, %v110_v17  ;;  %v112_v32 = vmul.f32 0.5, %v110_v17 }
  0xed   :  { %v117_v20 = vmul.f32 %v115_v18, %v109_v14  ;;  %v116_v21 = vmul.f32 %v114_v19, %v110_v17 }
  0xef   :  { %v119_v22 = vadd.f32 %v117_v20, %v109_v14  ;;  %v118_v23 = vmul.f32 %v116_v21, %v110_v17 }
  0xf1   :  { %v121_v24 = vmul.f32 0.7978846, %v119_v22  ;;  %v120_v25 = vadd.f32 %v118_v23, %v110_v17 }
  0xf3   :  { %169 = vtanh.f32 %v121_v24  ;;  %v122_v26 = vmul.f32 0.7978846, %v120_v25 }
  0xf5   :  { %171 = vtanh.f32 %v122_v26 }
  0xfd   :  { %v170_v27 = vpop.eup %169 }
  0xfe   :  { %v125_v29 = vadd.f32 1.0, %v170_v27 }
  0xff   :  { %v172_v30 = vpop.eup %171 }
 0x100   :  { %v127_v31 = vmul.f32 %v125_v29, %v111_v28  ;;  %v126_v33 = vadd.f32 1.0, %v172_v30 }
 0x102   :  { %v151_v34 = vpack.c.bf16 %v127_v31, %v127_v31  ;;  %v128_v35 = vmul.f32 %v126_v33, %v112_v32 }
 0x104   :  { %138 = vst.msk [vmem:[%s220_s3] sm:$0xf] %vm137_vm3, %v151_v34  ;;  %v152_v36 = vpack.c.bf16 %v128_v35, %v128_v35 }
 0x106   :  { %139 = vst.msk [vmem:[%s220_s3 + $0x4] sm:$0xf] %vm137_vm3, %v152_v36 }

// kernel: gloss_encoder_forward.16
= control target key start
LH: loop header
LB: loop body
LE: loop exit
PB: predicated region body
PF: predicated region fallthrough
CT: control target
= control target key end

     0   :  { %vm28_vm0 = vcmask 261120   ;;  %v247_v0 = vmov 0.0   ;;  %vm248_vm1 = vmmov 0   ;;  %vm72_vm2 = vcmask 523264   ;;  %s325_s1 = inlined_call_operand.vmem [shape: bf16[64,32], index: 1, kind: input, shape index: {}]   ;;  %s326_s0 = inlined_call_operand.vmem [shape: bf16[16,64], index: 0, kind: input, shape index: {}]   ;;  %s327_s3 = inlined_call_operand.vmem [shape: bf16[16,32], index: 3, kind: input, shape index: {}]   ;;  %s328_s2 = inlined_call_operand.vmem [shape: f32[1,32], index: 2, kind: input, shape index: {}]   ;;  %s329_s4 = inlined_call_operand.vmem [shape: f32[1,32], index: 4, kind: input, shape index: {}]   ;;  %s330_s5 = inlined_call_operand.vmem [shape: f32[1,32], index: 5, kind: input, shape index: {}]   ;;  %s331_s6 = inlined_call_operand.vmem [shape: bf16[16,32], index: 6, kind: output, shape index: {}]  }
   0x1   :  { %224 = vmatprep.subr.bf16.mxu0 %v247_v0  ;;  %v238_v1 = vld [vmem:[%s325_s1] sm:$0xff]   ;;  %232 = vmatprep.mubr.msk.bf16.mxu0 %vm248_vm1, %v247_v0  ;;  %29 = vst.msk [vmem:[#allocation2] sm:$0xff] %vm28_vm0, %v247_v0  ;;  %30 = vst.msk [vmem:[#allocation2 + $0x8] sm:$0xff] %vm28_vm0, %v247_v0  ;;  %v239_v2 = vld [vmem:[%s325_s1 + $0x8] sm:$0xff]   ;;  %vm195_vm3 = vcmask 257024  }
   0x2   :  { %225 = vmatpush3.bf16.msra.mxu0 %v238_v1  ;;  %v240_v3 = vld [vmem:[%s325_s1 + $0x10] sm:$0xff]   ;;  %v241_v4 = vld [vmem:[%s325_s1 + $0x18] sm:$0xff]   ;;  %v242_v5 = vld [vmem:[%s326_s0] sm:$0xff]  }
   0x3   :  { %226 = vmatprep.subr.bf16.mxu0 %v247_v0  ;;  %v216_v14 = vld [vmem:[%s327_s3] sm:$0xff]  }
   0x4   :  { %v208_v15 = vld [vmem:[%s328_s2] ss:$0 sm:$0xff]  ;;  %v217_v16 = vunpack.c.l.bf16 %v216_v14  ;;  %v218_v19 = vunpack.c.h.bf16 %v216_v14 }
   0x5   :  { %v209_v43 = vld [vmem:[%s329_s4] ss:$0 sm:$0xff] }
   0x6   :  { %227 = vmatpush3.bf16.msra.mxu0 %v239_v2  ;;  %v210_v45 = vld [vmem:[%s330_s5] ss:$0 sm:$0xff] }
   0x7   :  { %228 = vmatprep.subr.bf16.mxu0 %v247_v0 }
   0x8   :  { %v31_v6 = vld [vmem:[#allocation2] sm:$0xff]  ;;  %v32_v8 = vld [vmem:[#allocation2 + $0x8] sm:$0xff] }
   0xa   :  { %229 = vmatpush3.bf16.msra.mxu0 %v240_v3 }
   0xb   :  { %230 = vmatprep.subr.bf16.mxu0 %v247_v0 }
   0xe   :  { %231 = vmatpush3.bf16.msra.mxu0 %v241_v4 }
  0x11   :  { %233 = vmatmul.mubr.msk.bf16.vlgmr.msra.gmra.mrb[0].mxu0 %vm72_vm2, %v242_v5 }
  0xe4   :  { %v110_v7 = vpop.f32.mrb[0].mxu0 }
  0xe5   :  { %v117_v9 = vadd.f32 %v110_v7, %v31_v6  ;;  %v234_v10 = vpop.f32.mrb[1].mxu0 }
  0xe6   :  { %v113_v11 = vpop.f32.mrb[2].mxu0 }
  0xe7   :  { %120 = vst.msk [vmem:[#allocation2] sm:$0xff] %vm28_vm0, %v117_v9  ;;  %v118_v12 = vadd.f32 %v113_v11, %v32_v8  ;;  %v235_v13 = vpop.f32.mrb[3].mxu0 }
  0xe9   :  { %121 = vst.msk [vmem:[#allocation2 + $0x8] sm:$0xff] %vm28_vm0, %v118_v12 }
  0xee   :  { %v125_v17 = vld [vmem:[#allocation2] sm:$0xff] }
  0xef   :  { %v134_v18 = vadd.f32 %v208_v15, %v125_v17 }
  0xf0   :  { %v126_v20 = vld [vmem:[#allocation2 + $0x8] sm:$0xff] }
  0xf1   :  { %v140_v21 = vadd.f32 %v217_v16, %v134_v18  ;;  %v135_v22 = vadd.f32 %v208_v15, %v126_v20 }
  0xf3   :  { %v142_v23 = vsel %vm28_vm0, %v140_v21, 0.0  ;;  %v141_v24 = vadd.f32 %v218_v19, %v135_v22 }
  0xf4   :  { %143 = vadd.xlane.f32.xlu0 %v142_v23 }
  0xf5   :  { %v145_v25 = vsel %vm28_vm0, %v141_v24, 0.0 }
  0xf8   :  { %146 = vadd.xlane.f32.xlu0 %v145_v25 }
 0x181   :  { %v144_v26 = vpop.xlane.xlu0 %143 }
 0x182   :  { %v149_v27 = vmul.f32 0.03125, %v144_v26 }
 0x184   :  { %v151_v28 = vsub.f32 %v140_v21, %v149_v27 }
 0x185   :  { %v147_v29 = vpop.xlane.xlu0 %146 }
 0x186   :  { %v150_v30 = vmul.f32 0.03125, %v147_v29  ;;  %v153_v31 = vmul.f32 %v151_v28, %v151_v28 }
 0x188   :  { %v152_v32 = vsub.f32 %v141_v24, %v150_v30  ;;  %v155_v33 = vsel %vm28_vm0, %v153_v31, 0.0 }
 0x189   :  { %156 = vadd.xlane.f32.xlu1 %v155_v33 }
 0x18a   :  { %v154_v34 = vmul.f32 %v152_v32, %v152_v32 }
 0x18c   :  { %v158_v35 = vsel %vm28_vm0, %v154_v34, 0.0 }
 0x18d   :  { %159 = vadd.xlane.f32.xlu1 %v158_v35 }
 0x216   :  { %v157_v36 = vpop.xlane.xlu1 %156 }
 0x217   :  { %v161_v37 = vmul.f32 0.03125, %v157_v36 }
 0x219   :  { %v163_v38 = vadd.f32 1e-12, %v161_v37 }
 0x21a   :  { %v160_v39 = vpop.xlane.xlu1 %159 }
 0x21b   :  { %243 = vrsqrt.f32 %v163_v38  ;;  %v162_v40 = vmul.f32 0.03125, %v160_v39 }
 0x21d   :  { %v164_v41 = vadd.f32 1e-12, %v162_v40 }
 0x21f   :  { %245 = vrsqrt.f32 %v164_v41 }
 0x225   :  { %v244_v42 = vpop.eup %243 }
 0x226   :  { %v167_v44 = vmul.f32 %v244_v42, %v151_v28 }
 0x228   :  { %v176_v46 = vmul.f32 %v209_v43, %v167_v44 }
 0x229   :  { %v246_v47 = vpop.eup %245 }
 0x22a   :  { %v185_v48 = vadd.f32 %v210_v45, %v176_v46  ;;  %v168_v49 = vmul.f32 %v246_v47, %v152_v32 }
 0x22c   :  { %v213_v50 = vpack.c.bf16 %v185_v48, %v185_v48  ;;  %v177_v51 = vmul.f32 %v209_v43, %v168_v49 }
 0x22e   :  { %196 = vst.msk [vmem:[%s331_s6] sm:$0xf] %vm195_vm3, %v213_v50  ;;  %v186_v52 = vadd.f32 %v210_v45, %v177_v51 }
 0x230   :  { %v214_v53 = vpack.c.bf16 %v186_v52, %v186_v52 }
 0x232   :  { %197 = vst.msk [vmem:[%s331_s6 + $0x4] sm:$0xf] %vm195_vm3, %v214_v53 }

// kernel: gloss_encoder_forward.18
= control target key start
LH: loop header
LB: loop body
LE: loop exit
PB: predicated region body
PF: predicated region fallthrough
CT: control target
= control target key end

     0   :  { %s687_s15 = smov 0   ;;  %s689_s16 = smov 0   ;;  %s758_s0 = inlined_call_operand.vmem [shape: bf16[2,4,1,8], index: 0, kind: input, shape index: {}]   ;;  %s759_s1 = inlined_call_operand.vmem [shape: bf16[2,4,8,8], index: 1, kind: input, shape index: {}]   ;;  %s760_s2 = inlined_call_operand.vmem [shape: bf16[2,4,8,8], index: 2, kind: input, shape index: {}]   ;;  %s761_s3 = inlined_call_operand.vmem [shape: f32[2,1,8], index: 3, kind: input, shape index: {}]   ;;  %s762_s4 = inlined_call_operand.vmem [shape: bf16[2,4,1,8], index: 4, kind: output, shape index: {}]  }
   0x1   :  { %s691_s17 = smov 0   ;;  %s693_s18 = smov 0  }
   0x2   :  { %s695_s19 = smov 0  }
   0x3 LB: > { %s23_s20 = sadd.s32 1, %s650_s17  ;;  %s26_s21 = sadd.s32 1, %s654_s18  ;;  %s658_s19 = sphi %s695_s19, %s14_s19   ;;  %s654_s18 = sphi %s693_s18, %s766_s18   ;;  %s650_s17 = sphi %s691_s17, %s765_s17   ;;  %s646_s16 = sphi %s689_s16, %s764_s16   ;;  %s642_s15 = sphi %s687_s15, %s763_s15  }
   0x4   : > { %p24_p0 = scmp.ge.s32.totalorder %s23_s20, 4  ;;  %p547_p1 = scmp.ge.s32.totalorder %s658_s19, 1 }
   0x5   : > { %p218_p2 = scmp.lt.s32.totalorder %s658_s19, 9 }
   0x6   : > { %s768_s20 = smov (%p24_p0, %s23_s20), 0  ;;  %s770_s21 = smov (!%p24_p0, %s26_s21), %s654_s18 }
   0x7   : > { %p219_p3 = pnand %p547_p1, %p218_p2  ;;  %p28_p4 = scmp.ge.s32.totalorder %s770_s21, 2 }
   0x8   : > { %p267_p5 = scmp.lt.s32.totalorder (!%p219_p3), %s646_s16, 1  ;;  %p269_p6 = scmp.lt.s32.totalorder (!%p219_p3), %s642_s15, 3  ;;  %v660_v0 = vmov (!%p219_p3), 0.0   ;;  %vm661_vm0 = vmmov (!%p219_p3), 0   ;;  %vm305_vm1 = vcmask (!%p219_p3), 64512   ;;  %vm354_vm2 = vcmask (!%p219_p3), 57344  }
   0x9   : > { %s772_s21 = smov (%p28_p4, %s770_s21), 0  ;;  %222 = sbr.rel (%p219_p3) target bundleno = 778 (0x30a), region = 36 }
   0xa   : > { %562 = vmatprep.subr.bf16.mxu0 (!%p219_p3), %v660_v0  ;;  %564 = vmatprep.mubr.msk.bf16.mxu0 (!%p219_p3), %vm661_vm0, %v660_v0  ;;  %vm370_vm3 = vcmask (!%p219_p3), 1043456   ;;  %vm416_vm4 = vsmask.f32 (!%p219_p3), 256 }
   0xb   : > { %568 = vmatprep.subr.bf16.mxu1 (!%p219_p3), %v660_v0  ;;  %570 = vmatprep.mubr.msk.bf16.mxu1 (!%p219_p3), %vm661_vm0, %v660_v0  ;;  %vm417_vm5 = vmand (!%p219_p3), %vm354_vm2, %vm416_vm4 }
  0x10   : > { %s774_s16 = smov (!%p267_p5, %s646_s16), 1  ;;  %s776_s15 = smov (!%p269_p6, %s642_s15), 3 }
  0x11   : > { %s548_s22 = sshll.u32 %s774_s16, 2  ;;  %s292_s7 = scalar_lea.vmem %s761_s3, %s774_s16 }
  0x12   : > { %s717_s23 = sadd.s32 %s548_s22, %s776_s15  ;;  %v304_v5 = vld [vmem:[%s292_s7] sm:$0x1] }
  0x13   : > { %s550_s24 = sshll.u32 %s717_s23, 2  ;;  %s273_s30 = scalar_lea.vmem %s758_s0, %s717_s23 }
  0x14   : > { %s281_s27 = scalar_lea.vmem %s759_s1, %s550_s24  ;;  %v301_v3 = vld [vmem:[%s273_s30] sm:$0x1]  ;;  %s289_s10 = scalar_lea.vmem %s760_s2, %s550_s24 }
  0x15   : > { %v302_v1 = vld [vmem:[%s281_s27] sm:$0xf]  ;;  %s299_s13 = scalar_lea.vmem %s762_s4, %s717_s23 }
  0x16   : > { %v310_v2 = vsel %vm305_vm1, %v302_v1, 0  ;;  %v303_v17 = vld [vmem:[%s289_s10] sm:$0xf] }
  0x17   : > { %563 = vmatpush3.bf16.xpose.msra.mxu0 %v310_v2  ;;  %v372_v18 = vsel %vm370_vm3, %v303_v17, 0  ;;  %v418_v24 = vld [vmem:[%s299_s13] sm:$0x1] }
  0x18   : > { %569 = vmatpush3.bf16.msra.mxu1 %v372_v18 }
  0x1e   : > { %565 = vmatmul.mubr.msk.bf16.vlgmr.msra.gmra.mrb[0].mxu0 %vm305_vm1, %v301_v3 }
  0xf1   : > { %v346_v4 = vpop.f32.mrb[0].mxu0 }
  0xf2   : > { %v352_v6 = vmul.f32 0.35355338, %v346_v4  ;;  %v566_v7 = vpop.f32.mrb[1].mxu0 }
  0xf3   : > { %v349_v8 = vpop.f32.mrb[2].mxu0 }
  0xf4   : > { %v567_v9 = vpop.f32.mrb[3].mxu0  ;;  %v353_v10 = vadd.f32 %v352_v6, %v304_v5 }
  0xf6   : > { %v355_v11 = vsel %vm354_vm2, %v353_v10, -inf }
  0xf7   : > { %356 = vmax.xlane.f32.xlu0 %v355_v11 }
 0x184   : > { %v357_v12 = vpop.xlane.xlu0 %356 }
 0x185   : > { %v358_v13 = vsub.f32 %v353_v10, %v357_v12 }
 0x187   : > { %v359_v14 = vmul.f32 1.442695, %v358_v13 }
 0x189   : > { %616 = vpow2.f32 %v359_v14 }
 0x193   : > { %v617_v15 = vpop.eup %616 }
 0x194   : > { %v361_v16 = vsel %vm354_vm2, %v617_v15, 0.0 }
 0x195   : > { %362 = vadd.xlane.f32.xlu0 %v361_v16 }
 0x222   : > { %v363_v19 = vpop.xlane.xlu0 %362 }
 0x223   : > { %618 = vrcp.f32 %v363_v19 }
 0x22d   : > { %v619_v20 = vpop.eup %618 }
 0x22e   : > { %v365_v21 = vmul.f32 %v619_v20, %v617_v15 }
 0x230   : > { %v366_v22 = vpack.c.bf16 %v365_v21, %v365_v21 }
 0x232   : > { %571 = vmatmul.mubr.msk.bf16.vlgmr.msra.gmra.mrb[0].mxu1 %vm305_vm1, %v366_v22 }
 0x305   : > { %v408_v23 = vpop.f32.mrb[0].mxu1 }
 0x306   : > { %v414_v25 = vpack.c.bf16 %v408_v23, %v408_v23  ;;  %v572_v26 = vpop.f32.mrb[1].mxu1 }
 0x307   : > { %v411_v27 = vpop.f32.mrb[2].mxu1 }
 0x308   : > { %v419_v28 = vsel %vm417_vm5, %v414_v25, %v418_v24  ;;  %v573_v29 = vpop.f32.mrb[3].mxu1 }
 0x309   : > { %420 = vst [vmem:[%s299_s13] sm:$0x1] %v419_v28 }
 0x30a PF: > { %s14_s19 = sadd.s32 1, %s658_s19   ;;  %s763_s15 = smov %s650_s17 }
 0x30b   : > { %p11_p7 = scmp.ge.s32.totalorder %s14_s19, 10   ;;  %s764_s16 = smov %s654_s18 }
 0x30c   : > { %s765_s17 = smov %s768_s20  ;;  %s766_s18 = smov %s772_s21 }
 0x30d   :  { %13 = sbr.rel (!%p11_p7) target bundleno = 3 (0x3), region = 75 }

// kernel: gloss_encoder_forward.20
= control target key start
LH: loop header
LB: loop body
LE: loop exit
PB: predicated region body
PF: predicated region fallthrough
CT: control target
= control target key end

     0   :  { %vm19_vm0 = vcmask 517120   ;;  %v135_v0 = vmov 0.0   ;;  %vm136_vm1 = vmmov 0   ;;  %vm39_vm2 = vcmask 261120   ;;  %s174_s1 = inlined_call_operand.vmem [shape: bf16[32,64], index: 1, kind: input, shape index: {}]   ;;  %s175_s0 = inlined_call_operand.vmem [shape: bf16[2,32], index: 0, kind: input, shape index: {}]   ;;  %s176_s2 = inlined_call_operand.vmem [shape: f32[1,64], index: 2, kind: input, shape index: {}]   ;;  %s177_s3 = inlined_call_operand.vmem [shape: bf16[2,64], index: 3, kind: output, shape index: {}]  }
   0x1   :  { %20 = vst.msk [vmem:[#allocation2] sm:$0x3] %vm19_vm0, %v135_v0  ;;  %121 = vmatprep.subr.bf16.mxu0 %v135_v0  ;;  %v131_v1 = vld [vmem:[%s174_s1] sm:$0xff]   ;;  %125 = vmatprep.mubr.msk.bf16.mxu0 %vm136_vm1, %v135_v0  ;;  %v132_v2 = vld [vmem:[%s174_s1 + $0x8] sm:$0xff]   ;;  %vm108_vm3 = vcmask 516096  }
   0x2   :  { %122 = vmatpush3.bf16.msra.mxu0 %v131_v1  ;;  %v22_v3 = vld [vmem:[%s175_s0] sm:$0x1] }
   0x3   :  { %123 = vmatprep.subr.bf16.mxu0 %v135_v0  ;;  %v117_v10 = vld [vmem:[%s176_s2] ss:$0 sm:$0xff] }
   0x6   :  { %124 = vmatpush3.bf16.msra.mxu0 %v132_v2 }
   0x8   :  { %v21_v4 = vld [vmem:[#allocation2] sm:$0x3] }
   0x9   :  { %126 = vmatmul.mubr.msk.bf16.vlgmr.msra.gmra.mrb[0].mxu0 %vm39_vm2, %v22_v3 }
  0xdc   :  { %v77_v5 = vpop.f32.mrb[0].mxu0 }
  0xdd   :  { %v83_v6 = vadd.f32 %v77_v5, %v21_v4  ;;  %v127_v7 = vpop.f32.mrb[1].mxu0 }
  0xde   :  { %v80_v8 = vpop.f32.mrb[2].mxu0 }
  0xdf   :  { %85 = vst.msk [vmem:[#allocation2] sm:$0x3] %vm19_vm0, %v83_v6  ;;  %v128_v9 = vpop.f32.mrb[3].mxu0 }
  0xe6   :  { %v89_v11 = vld [vmem:[#allocation2] sm:$0x3] }
  0xe7   :  { %v97_v12 = vadd.f32 %v117_v10, %v89_v11 }
  0xe9   :  { %v99_v13 = vmul.f32 0.044715, %v97_v12  ;;  %v98_v19 = vmul.f32 0.5, %v97_v12 }
  0xeb   :  { %v100_v14 = vmul.f32 %v99_v13, %v97_v12 }
  0xed   :  { %v101_v15 = vmul.f32 %v100_v14, %v97_v12 }
  0xef   :  { %v102_v16 = vadd.f32 %v101_v15, %v97_v12 }
  0xf1   :  { %v103_v17 = vmul.f32 0.7978846, %v102_v16 }
  0xf3   :  { %133 = vtanh.f32 %v103_v17 }
  0xfd   :  { %v134_v18 = vpop.eup %133 }
  0xfe   :  { %v105_v20 = vadd.f32 1.0, %v134_v18 }
 0x100   :  { %v106_v21 = vmul.f32 %v105_v20, %v98_v19 }
 0x102   :  { %v107_v22 = vpack.c.bf16 %v106_v21, %v106_v21 }
 0x104   :  { %109 = vst.msk [vmem:[%s177_s3] sm:$0x1] %vm108_vm3, %v107_v22 }

// kernel: gloss_encoder_forward.19
= control target key start
LH: loop header
LB: loop body
LE: loop exit
PB: predicated region body
PF: predicated region fallthrough
CT: control target
= control target key end

     0   :  { %vm28_vm0 = vcmask 254976   ;;  %v170_v0 = vmov 0.0   ;;  %vm171_vm1 = vmmov 0   ;;  %vm48_vm2 = vcmask 261120   ;;  %s235_s1 = inlined_call_operand.vmem [shape: bf16[32,32], index: 1, kind: input, shape index: {}]   ;;  %s236_s0 = inlined_call_operand.vmem [shape: bf16[2,32], index: 0, kind: input, shape index: {}]   ;;  %s237_s3 = inlined_call_operand.vmem [shape: bf16[2,32], index: 3, kind: input, shape index: {}]   ;;  %s238_s2 = inlined_call_operand.vmem [shape: f32[1,32], index: 2, kind: input, shape index: {}]   ;;  %s239_s4 = inlined_call_operand.vmem [shape: f32[1,32], index: 4, kind: input, shape index: {}]   ;;  %s240_s5 = inlined_call_operand.vmem [shape: f32[1,32], index: 5, kind: input, shape index: {}]   ;;  %s241_s6 = inlined_call_operand.vmem [shape: bf16[2,32], index: 6, kind: output, shape index: {}]  }
   0x1   :  { %156 = vmatprep.subr.bf16.mxu0 %v170_v0  ;;  %v166_v1 = vld [vmem:[%s235_s1] sm:$0xff]   ;;  %160 = vmatprep.mubr.msk.bf16.mxu0 %vm171_vm1, %v170_v0  ;;  %29 = vst.msk [vmem:[#allocation2] sm:$0x3] %vm28_vm0, %v170_v0  ;;  %v167_v2 = vld [vmem:[%s235_s1 + $0x8] sm:$0xff]   ;;  %vm141_vm3 = vcmask 253952  }
   0x2   :  { %157 = vmatpush3.bf16.msra.mxu0 %v166_v1  ;;  %v31_v3 = vld [vmem:[%s236_s0] sm:$0x1] }
   0x3   :  { %158 = vmatprep.subr.bf16.mxu0 %v170_v0  ;;  %v107_v10 = vld [vmem:[%s237_s3] sm:$0x1] }
   0x4   :  { %v150_v11 = vld [vmem:[%s238_s2] ss:$0 sm:$0xff]  ;;  %v108_v12 = vunpack.c.l.bf16 %v107_v10 }
   0x5   :  { %v151_v26 = vld [vmem:[%s239_s4] ss:$0 sm:$0xff] }
   0x6   :  { %159 = vmatpush3.bf16.msra.mxu0 %v167_v2  ;;  %v152_v28 = vld [vmem:[%s240_s5] ss:$0 sm:$0xff] }
   0x8   :  { %v30_v4 = vld [vmem:[#allocation2] sm:$0x3] }
   0x9   :  { %161 = vmatmul.mubr.msk.bf16.vlgmr.msra.gmra.mrb[0].mxu0 %vm48_vm2, %v31_v3 }
  0xdc   :  { %v86_v5 = vpop.f32.mrb[0].mxu0 }
  0xdd   :  { %v92_v6 = vadd.f32 %v86_v5, %v30_v4  ;;  %v162_v7 = vpop.f32.mrb[1].mxu0 }
  0xde   :  { %v89_v8 = vpop.f32.mrb[2].mxu0 }
  0xdf   :  { %94 = vst.msk [vmem:[#allocation2] sm:$0x3] %vm28_vm0, %v92_v6  ;;  %v163_v9 = vpop.f32.mrb[3].mxu0 }
  0xe6   :  { %v98_v13 = vld [vmem:[#allocation2] sm:$0x3] }
  0xe7   :  { %v106_v14 = vadd.f32 %v150_v11, %v98_v13 }
  0xe9   :  { %v109_v15 = vadd.f32 %v108_v12, %v106_v14 }
  0xeb   :  { %v110_v16 = vsel %vm28_vm0, %v109_v15, 0.0 }
  0xec   :  { %111 = vadd.xlane.f32.xlu0 %v110_v16 }
 0x179   :  { %v112_v17 = vpop.xlane.xlu0 %111 }
 0x17a   :  { %v114_v18 = vmul.f32 0.03125, %v112_v17 }
 0x17c   :  { %v115_v19 = vsub.f32 %v109_v15, %v114_v18 }
 0x17e   :  { %v116_v20 = vmul.f32 %v115_v19, %v115_v19 }
 0x180   :  { %v117_v21 = vsel %vm28_vm0, %v116_v20, 0.0 }
 0x181   :  { %118 = vadd.xlane.f32.xlu0 %v117_v21 }
 0x20e   :  { %v119_v22 = vpop.xlane.xlu0 %118 }
 0x20f   :  { %v120_v23 = vmul.f32 0.03125, %v119_v22 }
 0x211   :  { %v121_v24 = vadd.f32 1e-12, %v120_v23 }
 0x213   :  { %168 = vrsqrt.f32 %v121_v24 }
 0x21d   :  { %v169_v25 = vpop.eup %168 }
 0x21e   :  { %v123_v27 = vmul.f32 %v169_v25, %v115_v19 }
 0x220   :  { %v131_v29 = vmul.f32 %v151_v26, %v123_v27 }
 0x222   :  { %v139_v30 = vadd.f32 %v152_v28, %v131_v29 }
 0x224   :  { %v140_v31 = vpack.c.bf16 %v139_v30, %v139_v30 }
 0x226   :  { %142 = vst.msk [vmem:[%s241_s6] sm:$0x1] %vm141_vm3, %v140_v31 }

// kernel: gloss_encoder_forward.21
= control target key start
LH: loop header
LB: loop body
LE: loop exit
PB: predicated region body
PF: predicated region fallthrough
CT: control target
= control target key end

     0   :  { %v239_v1 = vmov 0.0   ;;  %vm240_vm0 = vmmov 0   ;;  %vm29_vm1 = vcmask 254976   ;;  %s322_s0 = inlined_call_operand.vmem [shape: bf16[2,64], index: 0, kind: input, shape index: {}]   ;;  %s323_s1 = inlined_call_operand.vmem [shape: bf16[64,32], index: 1, kind: input, shape index: {}]   ;;  %s324_s2 = inlined_call_operand.vmem [shape: f32[1,32], index: 2, kind: input, shape index: {}]   ;;  %s325_s3 = inlined_call_operand.vmem [shape: bf16[2,32], index: 3, kind: input, shape index: {}]   ;;  %s326_s4 = inlined_call_operand.vmem [shape: f32[1,32], index: 4, kind: input, shape index: {}]   ;;  %s327_s5 = inlined_call_operand.vmem [shape: f32[1,32], index: 5, kind: input, shape index: {}]   ;;  %s328_s6 = inlined_call_operand.hbm [shape: f32[2,32], index: 6, kind: output, shape index: {}]  }
   0x1   :  { %v207_v0 = vld [vmem:[%s323_s1] sm:$0xff]   ;;  %192 = vmatprep.subr.bf16.mxu0 %v239_v1  ;;  %v208_v2 = vld [vmem:[%s323_s1 + $0x8] sm:$0xff]   ;;  %200 = vmatprep.mubr.msk.bf16.mxu0 %vm240_vm0, %v239_v1  ;;  %30 = vst.msk [vmem:[#allocation2] sm:$0x3] %vm29_vm1, %v239_v1 }
   0x2   :  { %193 = vmatpush3.bf16.msra.mxu0 %v207_v0 }
   0x3   :  { %194 = vmatprep.subr.bf16.mxu0 %v239_v1 }
   0x4   :  { %11 = vsyncpa [#allocation4], 0  ;;  %v209_v3 = vld [vmem:[%s323_s1 + $0x10] sm:$0xff]   ;;  %v210_v4 = vld [vmem:[%s323_s1 + $0x18] sm:$0xff]   ;;  %vm65_vm2 = vcmask 523264   ;;  %s241_s11 = smov [#allocation3]  }
   0x5   :  { %v32_v5 = vld [vmem:[%s322_s0] sm:$0x1]  ;;  %s171_s12 = sshll.u32 %s241_s11, 4  ;;  %s172_s12 = int_to_ptr.vmem [resolvable:$true] %s171_s12 }
   0x6   :  { %195 = vmatpush3.bf16.msra.mxu0 %v208_v2  ;;  %v124_v12 = vld [vmem:[%s325_s3] sm:$0x1]  ;;  %p220_p1 = scmp.lt.s32.totalorder %s172_s12, %s172_s12 }
   0x7   :  { %196 = vmatprep.subr.bf16.mxu0 %v239_v1  ;;  %v184_v13 = vld [vmem:[%s324_s2] ss:$0 sm:$0xff]  ;;  %v125_v14 = vunpack.c.l.bf16 %v124_v12 }
   0x8   :  { %v31_v6 = vld [vmem:[#allocation2] sm:$0x3] }
   0x9   :  { %v185_v28 = vld [vmem:[%s326_s4] ss:$0 sm:$0xff]  ;;  %s215_s4 = scalar_lea.vmem %s172_s12, 32 }
   0xa   :  { %197 = vmatpush3.bf16.msra.mxu0 %v209_v3  ;;  %v186_v30 = vld [vmem:[%s327_s5] ss:$0 sm:$0xff]  ;;  %p216_p0 = scmp.ne.s32.totalorder %s172_s12, %s215_s4  ;;  %p221_p2 = scmp.lt.s32.totalorder %s215_s4, %s215_s4 }
   0xb   :  { %198 = vmatprep.subr.bf16.mxu0 %v239_v1 }
   0xc   :  { %p222_p3 = por %p221_p2, %p220_p1 }
   0xe   :  { %199 = vmatpush3.bf16.msra.mxu0 %v210_v4  ;;  %p223_p4 = pnand %p222_p3, %p216_p0 }
  0x11   :  { %201 = vmatmul.mubr.msk.bf16.vlgmr.msra.gmra.mrb[0].mxu0 %vm65_vm2, %v32_v5 }
  0xe4   :  { %v103_v7 = vpop.f32.mrb[0].mxu0 }
  0xe5   :  { %v109_v8 = vadd.f32 %v103_v7, %v31_v6  ;;  %v202_v9 = vpop.f32.mrb[1].mxu0 }
  0xe6   :  { %v106_v10 = vpop.f32.mrb[2].mxu0 }
  0xe7   :  { %111 = vst.msk [vmem:[#allocation2] sm:$0x3] %vm29_vm1, %v109_v8  ;;  %v203_v11 = vpop.f32.mrb[3].mxu0 }
  0xee   :  { %v115_v15 = vld [vmem:[#allocation2] sm:$0x3] }
  0xef   :  { %v123_v16 = vadd.f32 %v184_v13, %v115_v15 }
  0xf1   :  { %v126_v17 = vadd.f32 %v125_v14, %v123_v16 }
  0xf3   :  { %v127_v18 = vsel %vm29_vm1, %v126_v17, 0.0 }
  0xf4   :  { %128 = vadd.xlane.f32.xlu0 %v127_v18 }
 0x181   :  { %v129_v19 = vpop.xlane.xlu0 %128 }
 0x182   :  { %v131_v20 = vmul.f32 0.03125, %v129_v19 }
 0x184   :  { %v132_v21 = vsub.f32 %v126_v17, %v131_v20 }
 0x186   :  { %v133_v22 = vmul.f32 %v132_v21, %v132_v21 }
 0x188   :  { %v134_v23 = vsel %vm29_vm1, %v133_v22, 0.0 }
 0x189   :  { %135 = vadd.xlane.f32.xlu0 %v134_v23 }
 0x216   :  { %v136_v24 = vpop.xlane.xlu0 %135 }
 0x217   :  { %v137_v25 = vmul.f32 0.03125, %v136_v24 }
 0x219   :  { %v138_v26 = vadd.f32 1e-12, %v137_v25 }
 0x21b   :  { %211 = vrsqrt.f32 %v138_v26 }
 0x225   :  { %v212_v27 = vpop.eup %211 }
 0x226   :  { %v140_v29 = vmul.f32 %v212_v27, %v132_v21 }
 0x228   :  { %v148_v31 = vmul.f32 %v185_v28, %v140_v29 }
 0x22a   :  { %v156_v32 = vadd.f32 %v186_v30, %v148_v31 }
 0x22c   :  { %v157_v33 = vmul.f32 %v156_v32, %v156_v32 }
 0x22e   :  { %v158_v34 = vsel %vm29_vm1, %v157_v33, 0.0 }
 0x22f   :  { %159 = vadd.xlane.f32.xlu1 %v158_v34 }
 0x2bc   :  { %v160_v35 = vpop.xlane.xlu1 %159 }
 0x2bd   :  { %v161_v36 = vmax.f32 %v160_v35, 1e-24 }
 0x2bf   :  { %213 = vrsqrt.f32 %v161_v36 }
 0x2c9   :  { %v214_v37 = vpop.eup %213 }
 0x2ca   :  { %v163_v38 = vmul.f32 %v214_v37, %v156_v32 }
 0x2cc   :  { %164 = vst.msk [vmem:[#allocation3] sm:$0x3] %vm29_vm1, %v163_v38 }
 0x2cd   :  { %226 = shalt.err (!%p223_p4)
}
 0x2ce   :  { %s227_s14 = scalar_lea.hbm %s328_s6, 32 }
 0x2cf   :  { %p228_p5 = scmp.ne.s32.totalorder %s328_s6, %s227_s14  ;;  %p231_p6 = scmp.lt.u32.totalorder %s227_s14, %s328_s6 }
 0x2d1   :  { %p233_p7 = pnand %p231_p6, %p228_p5 }
 0x2d3   :  { %236 = shalt.err (!%p233_p7)
}
 0x2d4   :  { %174 = dma.vmem_to_hbm [thread:$0]  %s172_s12, 32, %s328_s6, [#allocation4]  }
 0x2d5   :  { %237 = dma.done.wait [#allocation4], 32  }
 0x2d6   :  { %238 = vsyncadd [#allocation4], 4294967264 }
 0x2d7   :  { %178 = vsyncpa [#allocation4], 1 }

</bundles_post_ra>
